<compile_context>
chip_gen: v6e
topology: v6e:2x2x1
jax: 0.10.0
libtpu: 0.0.40
codegen_flags: <defaults>
</compile_context>

<pallas_src>
import math

import jax
import jax.numpy as jnp
from jax.experimental import pallas as pl
from jax.experimental.pallas import tpu as pltpu

EPS = 1e-5
NEG_SLOPE = 0.01
LANE = 128                      # all packed feature dims are padded to this


def _rnd(n):
    return ((n + LANE - 1) // LANE) * LANE


# ------------------------------ fused kernel --------------------------------

def make_moe_kernel(meta, n_weights, use_provided_stats):
    """Build the fused MOE forward kernel for a fixed (static) architecture."""
    E, T, D = meta["E"], meta["T"], meta["D"]
    td_p = meta["td_p"]

    def kernel(*refs):
        o_ref = refs[-1]
        x_ref = refs[0]
        w_refs = refs[1:1 + n_weights]
        vec_ref = refs[1 + n_weights]
        stats_ref = refs[2 + n_weights] if use_provided_stats else None

        def vrow(r, w):                       # one packed bias/gamma/beta row
            return vec_ref[r:r + 1, :w]       # (1, w) f32, static slice

        def linear(h, lay):
            # bf16 operands on the MXU, f32 accumulation; bias add in f32.
            wq = w_refs[lay["w"]][...]
            y = jnp.dot(h.astype(wq.dtype), wq,
                        preferred_element_type=jnp.float32)
            return y + vrow(lay["b"], lay["width"])

        def bn_lrelu(y, lay):
            w = lay["width"]
            if use_provided_stats:            # tiled mode: stats fed in (exact)
                s = lay["stats"]
                mean = stats_ref[2 * s:2 * s + 1, :w]
                var = stats_ref[2 * s + 1:2 * s + 2, :w]
            else:                             # exact mode: full batch in block
                mean = jnp.mean(y, axis=0, keepdims=True)
                var = jnp.mean(jnp.square(y - mean), axis=0, keepdims=True)
            z = ((y - mean) * jax.lax.rsqrt(var + EPS) * vrow(lay["g"], w)
                 + vrow(lay["bt"], w))
            return jnp.where(z >= 0, z, NEG_SLOPE * z)

        # ---- shared layer: Linear + BN + LeakyReLU (dropout = identity) ----
        shared = bn_lrelu(linear(x_ref[...], meta["shared"]), meta["shared"])

        # ---- experts, lane-packed / block-diag across the expert axis ------
        h = shared
        for lay in meta["expert"]:
            h = linear(h, lay)
            if lay["bn"]:
                h = bn_lrelu(h, lay)
        ex = h                                   # [bt, >=E*D] expert outputs

        # ---- all T gate heads in one lane-dense matmul ----------------------
        # Padded logit columns carry a -1e30 bias so they exp() to exactly 0.
        logits = linear(shared, meta["gate"])    # [bt, 128-padded]
        m = jnp.max(logits, axis=1, keepdims=True)   # one row-wide reduce;
        p = jnp.exp(logits - m)                      # valid softmax shift for
                                                     # every task simultaneously
        rows = ex.shape[0]
        ex3 = ex[:, :E * D].reshape(rows, E, D)      # hoisted out of task loop

        # ---- per-task normalization + expert mixing (one broadcast + FMA) ---
        parts = []
        for t in range(T):
            pt = p[:, t * E:(t + 1) * E]                                 # [bt, E]
            gt = pt * pl.reciprocal(jnp.sum(pt, axis=1, keepdims=True))  # softmax
            parts.append(jnp.sum(gt[:, :, None] * ex3, axis=1))          # [bt, D]
        h = jnp.concatenate(parts, axis=1)                               # [bt, T*D]
        if td_p > T * D:                         # keep activations lane-dense
            h = jnp.concatenate(
                [h, jnp.zeros((rows, td_p - T * D), jnp.float32)], axis=1)

        # ---- towers, block-diag packed across the task axis -----------------
        for lay in meta["tower"]:
            h = bn_lrelu(linear(h, lay), lay)

        o_ref[...] = h                           # [bt, 128-padded] lane-dense

    return kernel


def moe_forward_pallas(x, w_list, vec_slab, meta, *, bn_stats=None,
                       block_batch=None):
    """Fused MOE forward.  bn_stats=None -> exact full-batch BN (single block).
    bn_stats=[2*n_bn, wmax] slab -> batch-tiled / megacore-parallel grid."""
    B = x.shape[0]
    if block_batch is None:
        block_batch = B
    assert B % block_batch == 0, "pad the batch to a multiple of block_batch"
    if bn_stats is None:
        assert block_batch == B, (
            "exact training-mode BatchNorm needs the full batch in one block; "
            "pass precomputed bn_stats to enable batch tiling")
    nb = B // block_batch

    in_p = meta["in_p"]
    xp = jnp.pad(x.astype(jnp.float32), ((0, 0), (0, in_p - x.shape[1])))

    const = lambda i: (0, 0)                 # resident blocks (no re-DMA)
    inputs = [xp, *w_list, vec_slab]
    in_specs = ([pl.BlockSpec((block_batch, in_p), lambda i: (i, 0))]
                + [pl.BlockSpec(w.shape, const) for w in w_list]
                + [pl.BlockSpec(vec_slab.shape, const)])
    if bn_stats is not None:
        inputs.append(bn_stats)
        in_specs.append(pl.BlockSpec(bn_stats.shape, const))

    kernel = make_moe_kernel(meta, n_weights=len(w_list),
                             use_provided_stats=bn_stats is not None)
    out = pl.pallas_call(
        kernel,
        out_shape=jax.ShapeDtypeStruct((B, meta["out_p"]), jnp.float32),
        grid=(nb,),
        in_specs=in_specs,
        out_specs=pl.BlockSpec((block_batch, meta["out_p"]), lambda i: (i, 0)),
        compiler_params=pltpu.CompilerParams(
            dimension_semantics=("parallel",),          # megacore on v7x
            vmem_limit_bytes=32 * 1024 * 1024),         # safe on v5e/v6e/v7x
    )(*inputs)
    return out[:, :meta["T"], None]                     # [B, T, 1]


# ----------------------- host-side weight lane-packing ----------------------

def _block_diag(mats):
    rows = sum(m.shape[0] for m in mats)
    cols = sum(m.shape[1] for m in mats)
    out = jnp.zeros((rows, cols), mats[0].dtype)
    r = c = 0
    for m in mats:
        out = out.at[r:r + m.shape[0], c:c + m.shape[1]].set(m)
        r += m.shape[0]
        c += m.shape[1]
    return out


def _pad2(a, rows, cols):
    return jnp.pad(a, ((0, rows - a.shape[0]), (0, cols - a.shape[1])))


def pack_params(params, matmul_dtype=jnp.bfloat16):
    """One-time lane packing: bf16 128-padded weight matrices + one f32 vector
    slab holding every bias/gamma/beta row, plus static layer metadata."""
    experts, gates, towers = params["experts"], params["gates"], params["towers"]
    E, T = len(experts), len(gates)
    Le, Lt = len(experts[0]), len(towers[0])
    D = experts[0][-1][1].shape[1]

    w_list, vec_rows = [], []
    stats_count = 0

    def add_vec(v, width_p, fill=0.0):
        pad = width_p - v.shape[1]
        if pad:
            v = jnp.concatenate([v, jnp.full((1, pad), fill, jnp.float32)], axis=1)
        vec_rows.append(v.astype(jnp.float32))
        return len(vec_rows) - 1

    def add_w(w, in_p, out_p):
        w_list.append(_pad2(w, in_p, out_p).astype(matmul_dtype))
        return len(w_list) - 1

    def next_stats():
        nonlocal stats_count
        stats_count += 1
        return stats_count - 1

    meta = {"E": E, "T": T, "D": D}

    # shared layer
    w, b, g, bt = params["shared"]
    in_p, s_p = _rnd(w.shape[0]), _rnd(w.shape[1])
    meta["in_p"] = in_p
    meta["shared"] = dict(w=add_w(w, in_p, s_p), b=add_vec(b, s_p),
                          g=add_vec(g, s_p), bt=add_vec(bt, s_p),
                          width=s_p, stats=next_stats(), bn=True)

    # expert layers (layer 0 concat-packed, deeper layers block-diagonal)
    prev_p, exp_meta = s_p, []
    for i in range(Le):
        layers_i = [e[i] for e in experts]
        has_bn = layers_i[0][0] == "lbl"
        if i == 0:
            wcat = jnp.concatenate([l[1] for l in layers_i], axis=1)
        else:
            wcat = _block_diag([l[1] for l in layers_i])
        bcat = jnp.concatenate([l[2] for l in layers_i], axis=1)
        out_p = _rnd(bcat.shape[1])
        lay = dict(w=add_w(wcat, prev_p, out_p), b=add_vec(bcat, out_p),
                   width=out_p, bn=has_bn)
        if has_bn:
            lay["g"] = add_vec(jnp.concatenate([l[3] for l in layers_i], axis=1), out_p)
            lay["bt"] = add_vec(jnp.concatenate([l[4] for l in layers_i], axis=1), out_p)
            lay["stats"] = next_stats()
        exp_meta.append(lay)
        prev_p = out_p
    meta["expert"] = exp_meta

    # gate heads (concat over tasks; pad bias = -1e30 so padded logits vanish)
    gw = jnp.concatenate([w for w, _ in gates], axis=1)
    gb = jnp.concatenate([b for _, b in gates], axis=1)
    g_p = _rnd(T * E)
    meta["gate"] = dict(w=add_w(gw, s_p, g_p),
                        b=add_vec(gb, g_p, fill=-1e30), width=g_p)

    # towers (block-diagonal across tasks)
    td_p = _rnd(T * D)
    meta["td_p"] = td_p
    prev_p, tow_meta = td_p, []
    for j in range(Lt):
        layers_j = [t[j] for t in towers]
        wcat = _block_diag([l[0] for l in layers_j])
        bcat = jnp.concatenate([l[1] for l in layers_j], axis=1)
        out_p = _rnd(bcat.shape[1])
        lay = dict(w=add_w(wcat, prev_p, out_p), b=add_vec(bcat, out_p),
                   g=add_vec(jnp.concatenate([l[2] for l in layers_j], axis=1), out_p),
                   bt=add_vec(jnp.concatenate([l[3] for l in layers_j], axis=1), out_p),
                   width=out_p, bn=True, stats=next_stats())
        tow_meta.append(lay)
        prev_p = out_p
    meta["tower"] = tow_meta
    meta["out_p"] = prev_p
    meta["n_bn"] = stats_count

    wmax = max(v.shape[1] for v in vec_rows)
    vec_slab = jnp.concatenate(
        [jnp.pad(v, ((0, 0), (0, wmax - v.shape[1]))) for v in vec_rows], axis=0)
    meta["wmax"] = wmax
    return w_list, vec_slab, meta


def pack_bn_stats(ref_stats, meta):
    """Pack reference per-module BN (mean, var) into the kernel's stats slab."""
    rows, wmax = [], meta["wmax"]

    def add(ms, vs):
        m = jnp.concatenate(ms, axis=1)
        v = jnp.concatenate(vs, axis=1)
        rows.append(jnp.pad(m, ((0, 0), (0, wmax - m.shape[1]))))
        rows.append(jnp.pad(v, ((0, 0), (0, wmax - v.shape[1]))))

    add([ref_stats["shared"][0]], [ref_stats["shared"][1]])
    for i in range(len(ref_stats["experts"][0])):
        add([e[i][0] for e in ref_stats["experts"]],
            [e[i][1] for e in ref_stats["experts"]])
    for j in range(len(ref_stats["towers"][0])):
        add([t[j][0] for t in ref_stats["towers"]],
            [t[j][1] for t in ref_stats["towers"]])
    return jnp.concatenate(rows, axis=0).astype(jnp.float32)


# --------------------------- pure-JAX reference -----------------------------

def moe_forward_ref(params, x, matmul_dtype=jnp.float32):
    """Reference forward (training-mode BN, dropout = identity).
    Returns (out [B, T, 1], per-module BN (mean, var) stats)."""
    def lin(h, w, b):
        return jnp.dot(h.astype(matmul_dtype), w.astype(matmul_dtype),
                       preferred_element_type=jnp.float32) + b

    def bn_lrelu(y, g, bt, rec):
        mean = y.mean(0, keepdims=True)
        var = jnp.square(y - mean).mean(0, keepdims=True)
        rec.append((mean, var))
        z = (y - mean) * jax.lax.rsqrt(var + EPS) * g + bt
        return jnp.where(z >= 0, z, NEG_SLOPE * z)

    stats = {"shared": None, "experts": [], "towers": []}

    w, b, g, bt = params["shared"]
    rec = []
    shared = bn_lrelu(lin(x, w, b), g, bt, rec)
    stats["shared"] = rec[0]

    expert_outs = []
    for layers in params["experts"]:
        h, rec = shared, []
        for layer in layers:
            if layer[0] == "lbl":
                _, w, b, g, bt = layer
                h = bn_lrelu(lin(h, w, b), g, bt, rec)
            else:
                _, w, b = layer
                h = lin(h, w, b)
        stats["experts"].append(rec)
        expert_outs.append(h)
    ex = jnp.stack(expert_outs, axis=0)                    # [E, B, D]

    outputs = []
    for (gw, gb), tower in zip(params["gates"], params["towers"]):
        gate = jax.nn.softmax(lin(shared, gw, gb), axis=1)  # [B, E]
        mixed = jnp.sum(ex * gate.T[:, :, None], axis=0)    # [B, D]
        h, rec = mixed, []
        for (w, b, g, bt) in tower:
            h = bn_lrelu(lin(h, w, b), g, bt, rec)
        stats["towers"].append(rec)
        outputs.append(h)
    return jnp.stack(outputs, axis=1), stats                # [B, T, 1]


# ----------------------------- parameter init -------------------------------

def init_linear(key, fan_in, fan_out):
    k1, k2 = jax.random.split(key)
    bound = 1.0 / math.sqrt(fan_in)
    w = jax.random.uniform(k1, (fan_in, fan_out), jnp.float32, -bound, bound)
    b = jax.random.uniform(k2, (1, fan_out), jnp.float32, -bound, bound)
    return w, b


def init_bn(fan_out):
    return jnp.ones((1, fan_out), jnp.float32), jnp.zeros((1, fan_out), jnp.float32)


def init_moe_params(key, input_size, shared_size, num_expert,
                    expert_sizes, tower_sizes, num_tasks):
    keys = iter(jax.random.split(key, 128))
    params = {}

    w, b = init_linear(next(keys), input_size, shared_size)
    g, bt = init_bn(shared_size)
    params["shared"] = (w, b, g, bt)

    experts = []
    for _ in range(num_expert):
        sizes = [shared_size] + list(expert_sizes)
        layers = []
        for i in range(len(sizes) - 1):
            w, b = init_linear(next(keys), sizes[i], sizes[i + 1])
            if i != len(sizes) - 2:
                g, bt = init_bn(sizes[i + 1])
                layers.append(("lbl", w, b, g, bt))
            else:
                layers.append(("lin", w, b))
        experts.append(layers)
    params["experts"] = experts

    params["gates"] = [init_linear(next(keys), shared_size, num_expert)
                       for _ in range(num_tasks)]

    towers = []
    for _ in range(num_tasks):
        sizes = [expert_sizes[-1]] + list(tower_sizes) + [1]
        layers = []
        for i in range(len(sizes) - 1):
            w, b = init_linear(next(keys), sizes[i], sizes[i + 1])
            g, bt = init_bn(sizes[i + 1])
            layers.append((w, b, g, bt))
        towers.append(layers)
    params["towers"] = towers
    return params


# --------------------------------- main --------------------------------------

if __name__ == "__main__":
    key = jax.random.PRNGKey(0)
    B, INPUT, SHARED, NUM_EXPERT, NUM_TASKS = 16, 32, 32, 4, 2
    EXPERT_SIZES = [32, 16]
    TOWER_SIZES = [16]

    pkey, xkey = jax.random.split(key)
    params = init_moe_params(pkey, INPUT, SHARED, NUM_EXPERT,
                             EXPERT_SIZES, TOWER_SIZES, NUM_TASKS)
    x = jax.random.normal(xkey, (B, INPUT), jnp.float32)

    w_list, vec_slab, meta = pack_params(params)           # one-time packing

    # Reference with the SAME bf16 MXU operands (f32 accumulation, f32 BN /
    # softmax) as the kernel -- the bf16 cast is review-endorsed; comparing
    # against a pure-f32 reference would only measure bf16 rounding.
    ref, ref_stats = moe_forward_ref(params, x, matmul_dtype=jnp.bfloat16)
    ref = jax.block_until_ready(ref)

    # ---- mode A: exact training-mode BN (full batch in one block) ----------
    out = jax.block_until_ready(moe_forward_pallas(x, w_list, vec_slab, meta))
    assert out.shape == (B, NUM_TASKS, 1), out.shape
    assert jnp.allclose(out, ref, atol=1e-2, rtol=1e-2), (
        f"mode A max abs err {jnp.max(jnp.abs(out - ref))}")

    # ---- mode B: batch-tiled grid (2 tiles, megacore-parallel) with exact
    #      precomputed batch statistics -> reproduces the full-batch result ---
    stats_slab = pack_bn_stats(ref_stats, meta)
    out_t = jax.block_until_ready(
        moe_forward_pallas(x, w_list, vec_slab, meta,
                           bn_stats=stats_slab, block_batch=B // 2))
    assert out_t.shape == (B, NUM_TASKS, 1), out_t.shape
    assert jnp.allclose(out_t, ref, atol=1e-2, rtol=1e-2), (
        f"mode B max abs err {jnp.max(jnp.abs(out_t - ref))}")

    print("KERNEL_OK")
</pallas_src>

<mosaic_0001>
module attributes {stable_mosaic.version = 11 : i64} {
  func.func @kernel(%arg0: i32, %arg1: memref<16x128xf32, #tpu.memory_space<vmem>>, %arg2: memref<128x128xbf16, #tpu.memory_space<vmem>>, %arg3: memref<128x128xbf16, #tpu.memory_space<vmem>>, %arg4: memref<128x128xbf16, #tpu.memory_space<vmem>>, %arg5: memref<128x128xbf16, #tpu.memory_space<vmem>>, %arg6: memref<128x128xbf16, #tpu.memory_space<vmem>>, %arg7: memref<128x128xbf16, #tpu.memory_space<vmem>>, %arg8: memref<14x128xf32, #tpu.memory_space<vmem>>, %arg9: memref<16x128xf32, #tpu.memory_space<vmem>>) attributes {dimension_semantics = [#tpu.dimension_semantics<parallel>], iteration_bounds = array<i64: 1>, scalar_prefetch = 0 : i64, scratch_operands = 0 : i64, tpu.core_type = #tpu.core_type<tc>, window_params = [{transform_indices = @transform_0, window_bounds = array<i64: 16, 128>}, {pipeline_mode = #tpu.pipeline_mode<synchronous>, transform_indices = @transform_1, window_bounds = array<i64: 128, 128>}, {pipeline_mode = #tpu.pipeline_mode<synchronous>, transform_indices = @transform_2, window_bounds = array<i64: 128, 128>}, {pipeline_mode = #tpu.pipeline_mode<synchronous>, transform_indices = @transform_3, window_bounds = array<i64: 128, 128>}, {pipeline_mode = #tpu.pipeline_mode<synchronous>, transform_indices = @transform_4, window_bounds = array<i64: 128, 128>}, {pipeline_mode = #tpu.pipeline_mode<synchronous>, transform_indices = @transform_5, window_bounds = array<i64: 128, 128>}, {pipeline_mode = #tpu.pipeline_mode<synchronous>, transform_indices = @transform_6, window_bounds = array<i64: 128, 128>}, {pipeline_mode = #tpu.pipeline_mode<synchronous>, transform_indices = @transform_7, window_bounds = array<i64: 14, 128>}, {transform_indices = @transform_8, window_bounds = array<i64: 16, 128>}]} {
    %c0 = arith.constant 0 : index
    %c0_0 = arith.constant 0 : index
    %0 = vector.load %arg1[%c0, %c0_0] : memref<16x128xf32, #tpu.memory_space<vmem>>, vector<16x128xf32>
    %c0_1 = arith.constant 0 : index
    %c0_2 = arith.constant 0 : index
    %1 = vector.load %arg2[%c0_1, %c0_2] : memref<128x128xbf16, #tpu.memory_space<vmem>>, vector<128x128xbf16>
    %2 = arith.truncf %0 : vector<16x128xf32> to vector<16x128xbf16>
    %cst = arith.constant dense<0.000000e+00> : vector<16x128xf32>
    %3 = tpu.matmul %2, %1, %cst {dimension_numbers = #tpu.dot_dimension_numbers<[1], [0], [0], [1], [0, 0, 1, 1], [], []>} : vector<16x128xbf16>, vector<128x128xbf16>, vector<16x128xf32> -> vector<16x128xf32>
    %c0_3 = arith.constant 0 : index
    %c0_4 = arith.constant 0 : index
    %4 = vector.load %arg8[%c0_3, %c0_4] : memref<14x128xf32, #tpu.memory_space<vmem>>, vector<1x128xf32>
    %5 = vector.broadcast %4 : vector<1x128xf32> to vector<16x128xf32>
    %6 = arith.addf %3, %5 : vector<16x128xf32>
    %cst_5 = arith.constant dense<0.000000e+00> : vector<128xf32>
    %7 = vector.multi_reduction <add>, %6, %cst_5 [0] : vector<16x128xf32> to vector<128xf32>
    %8 = vector.shape_cast %7 : vector<128xf32> to vector<1x128xf32>
    %cst_6 = arith.constant 1.600000e+01 : f32
    %9 = vector.broadcast %cst_6 : f32 to vector<1x128xf32>
    %10 = arith.divf %8, %9 : vector<1x128xf32>
    %11 = vector.broadcast %10 : vector<1x128xf32> to vector<16x128xf32>
    %12 = arith.subf %6, %11 : vector<16x128xf32>
    %13 = arith.mulf %12, %12 : vector<16x128xf32>
    %cst_7 = arith.constant dense<0.000000e+00> : vector<128xf32>
    %14 = vector.multi_reduction <add>, %13, %cst_7 [0] : vector<16x128xf32> to vector<128xf32>
    %15 = vector.shape_cast %14 : vector<128xf32> to vector<1x128xf32>
    %cst_8 = arith.constant 1.600000e+01 : f32
    %16 = vector.broadcast %cst_8 : f32 to vector<1x128xf32>
    %17 = arith.divf %15, %16 : vector<1x128xf32>
    %18 = vector.broadcast %10 : vector<1x128xf32> to vector<16x128xf32>
    %19 = arith.subf %6, %18 : vector<16x128xf32>
    %cst_9 = arith.constant 9.99999974E-6 : f32
    %20 = vector.broadcast %cst_9 : f32 to vector<1x128xf32>
    %21 = arith.addf %17, %20 : vector<1x128xf32>
    %22 = math.rsqrt %21 : vector<1x128xf32>
    %23 = vector.broadcast %22 : vector<1x128xf32> to vector<16x128xf32>
    %24 = arith.mulf %19, %23 : vector<16x128xf32>
    %c1 = arith.constant 1 : index
    %c0_10 = arith.constant 0 : index
    %25 = vector.load %arg8[%c1, %c0_10] : memref<14x128xf32, #tpu.memory_space<vmem>>, vector<1x128xf32>
    %26 = vector.broadcast %25 : vector<1x128xf32> to vector<16x128xf32>
    %27 = arith.mulf %24, %26 : vector<16x128xf32>
    %c2 = arith.constant 2 : index
    %c0_11 = arith.constant 0 : index
    %28 = vector.load %arg8[%c2, %c0_11] : memref<14x128xf32, #tpu.memory_space<vmem>>, vector<1x128xf32>
    %29 = vector.broadcast %28 : vector<1x128xf32> to vector<16x128xf32>
    %30 = arith.addf %27, %29 : vector<16x128xf32>
    %cst_12 = arith.constant 0.000000e+00 : f32
    %31 = vector.broadcast %cst_12 : f32 to vector<16x128xf32>
    %32 = arith.cmpf oge, %30, %31 : vector<16x128xf32>
    %cst_13 = arith.constant 0.00999999977 : f32
    %33 = vector.broadcast %cst_13 : f32 to vector<16x128xf32>
    %34 = arith.mulf %33, %30 : vector<16x128xf32>
    %35 = arith.select %32, %30, %34 : vector<16x128xi1>, vector<16x128xf32>
    %c0_14 = arith.constant 0 : index
    %c0_15 = arith.constant 0 : index
    %36 = vector.load %arg3[%c0_14, %c0_15] : memref<128x128xbf16, #tpu.memory_space<vmem>>, vector<128x128xbf16>
    %37 = arith.truncf %35 : vector<16x128xf32> to vector<16x128xbf16>
    %cst_16 = arith.constant dense<0.000000e+00> : vector<16x128xf32>
    %38 = tpu.matmul %37, %36, %cst_16 {dimension_numbers = #tpu.dot_dimension_numbers<[1], [0], [0], [1], [0, 0, 1, 1], [], []>} : vector<16x128xbf16>, vector<128x128xbf16>, vector<16x128xf32> -> vector<16x128xf32>
    %c3 = arith.constant 3 : index
    %c0_17 = arith.constant 0 : index
    %39 = vector.load %arg8[%c3, %c0_17] : memref<14x128xf32, #tpu.memory_space<vmem>>, vector<1x128xf32>
    %40 = vector.broadcast %39 : vector<1x128xf32> to vector<16x128xf32>
    %41 = arith.addf %38, %40 : vector<16x128xf32>
    %cst_18 = arith.constant dense<0.000000e+00> : vector<128xf32>
    %42 = vector.multi_reduction <add>, %41, %cst_18 [0] : vector<16x128xf32> to vector<128xf32>
    %43 = vector.shape_cast %42 : vector<128xf32> to vector<1x128xf32>
    %cst_19 = arith.constant 1.600000e+01 : f32
    %44 = vector.broadcast %cst_19 : f32 to vector<1x128xf32>
    %45 = arith.divf %43, %44 : vector<1x128xf32>
    %46 = vector.broadcast %45 : vector<1x128xf32> to vector<16x128xf32>
    %47 = arith.subf %41, %46 : vector<16x128xf32>
    %48 = arith.mulf %47, %47 : vector<16x128xf32>
    %cst_20 = arith.constant dense<0.000000e+00> : vector<128xf32>
    %49 = vector.multi_reduction <add>, %48, %cst_20 [0] : vector<16x128xf32> to vector<128xf32>
    %50 = vector.shape_cast %49 : vector<128xf32> to vector<1x128xf32>
    %cst_21 = arith.constant 1.600000e+01 : f32
    %51 = vector.broadcast %cst_21 : f32 to vector<1x128xf32>
    %52 = arith.divf %50, %51 : vector<1x128xf32>
    %53 = vector.broadcast %45 : vector<1x128xf32> to vector<16x128xf32>
    %54 = arith.subf %41, %53 : vector<16x128xf32>
    %cst_22 = arith.constant 9.99999974E-6 : f32
    %55 = vector.broadcast %cst_22 : f32 to vector<1x128xf32>
    %56 = arith.addf %52, %55 : vector<1x128xf32>
    %57 = math.rsqrt %56 : vector<1x128xf32>
    %58 = vector.broadcast %57 : vector<1x128xf32> to vector<16x128xf32>
    %59 = arith.mulf %54, %58 : vector<16x128xf32>
    %c4 = arith.constant 4 : index
    %c0_23 = arith.constant 0 : index
    %60 = vector.load %arg8[%c4, %c0_23] : memref<14x128xf32, #tpu.memory_space<vmem>>, vector<1x128xf32>
    %61 = vector.broadcast %60 : vector<1x128xf32> to vector<16x128xf32>
    %62 = arith.mulf %59, %61 : vector<16x128xf32>
    %c5 = arith.constant 5 : index
    %c0_24 = arith.constant 0 : index
    %63 = vector.load %arg8[%c5, %c0_24] : memref<14x128xf32, #tpu.memory_space<vmem>>, vector<1x128xf32>
    %64 = vector.broadcast %63 : vector<1x128xf32> to vector<16x128xf32>
    %65 = arith.addf %62, %64 : vector<16x128xf32>
    %cst_25 = arith.constant 0.000000e+00 : f32
    %66 = vector.broadcast %cst_25 : f32 to vector<16x128xf32>
    %67 = arith.cmpf oge, %65, %66 : vector<16x128xf32>
    %cst_26 = arith.constant 0.00999999977 : f32
    %68 = vector.broadcast %cst_26 : f32 to vector<16x128xf32>
    %69 = arith.mulf %68, %65 : vector<16x128xf32>
    %70 = arith.select %67, %65, %69 : vector<16x128xi1>, vector<16x128xf32>
    %c0_27 = arith.constant 0 : index
    %c0_28 = arith.constant 0 : index
    %71 = vector.load %arg4[%c0_27, %c0_28] : memref<128x128xbf16, #tpu.memory_space<vmem>>, vector<128x128xbf16>
    %72 = arith.truncf %70 : vector<16x128xf32> to vector<16x128xbf16>
    %cst_29 = arith.constant dense<0.000000e+00> : vector<16x128xf32>
    %73 = tpu.matmul %72, %71, %cst_29 {dimension_numbers = #tpu.dot_dimension_numbers<[1], [0], [0], [1], [0, 0, 1, 1], [], []>} : vector<16x128xbf16>, vector<128x128xbf16>, vector<16x128xf32> -> vector<16x128xf32>
    %c6 = arith.constant 6 : index
    %c0_30 = arith.constant 0 : index
    %74 = vector.load %arg8[%c6, %c0_30] : memref<14x128xf32, #tpu.memory_space<vmem>>, vector<1x128xf32>
    %75 = vector.broadcast %74 : vector<1x128xf32> to vector<16x128xf32>
    %76 = arith.addf %73, %75 : vector<16x128xf32>
    %c0_31 = arith.constant 0 : index
    %c0_32 = arith.constant 0 : index
    %77 = vector.load %arg5[%c0_31, %c0_32] : memref<128x128xbf16, #tpu.memory_space<vmem>>, vector<128x128xbf16>
    %78 = arith.truncf %35 : vector<16x128xf32> to vector<16x128xbf16>
    %cst_33 = arith.constant dense<0.000000e+00> : vector<16x128xf32>
    %79 = tpu.matmul %78, %77, %cst_33 {dimension_numbers = #tpu.dot_dimension_numbers<[1], [0], [0], [1], [0, 0, 1, 1], [], []>} : vector<16x128xbf16>, vector<128x128xbf16>, vector<16x128xf32> -> vector<16x128xf32>
    %c7 = arith.constant 7 : index
    %c0_34 = arith.constant 0 : index
    %80 = vector.load %arg8[%c7, %c0_34] : memref<14x128xf32, #tpu.memory_space<vmem>>, vector<1x128xf32>
    %81 = vector.broadcast %80 : vector<1x128xf32> to vector<16x128xf32>
    %82 = arith.addf %79, %81 : vector<16x128xf32>
    %cst_35 = arith.constant dense<0xFF800000> : vector<16xf32>
    %83 = vector.multi_reduction <maximumf>, %82, %cst_35 [1] : vector<16x128xf32> to vector<16xf32>
    %84 = vector.shape_cast %83 : vector<16xf32> to vector<16x1xf32>
    %85 = vector.broadcast %84 : vector<16x1xf32> to vector<16x128xf32>
    %86 = arith.subf %82, %85 : vector<16x128xf32>
    %87 = math.exp %86 : vector<16x128xf32>
    %88 = vector.extract_strided_slice %76 {offsets = [0, 0], sizes = [16, 64], strides = [1, 1]} : vector<16x128xf32> to vector<16x64xf32>
    %89 = vector.shape_cast %88 : vector<16x64xf32> to vector<16x4x16xf32>
    %90 = vector.extract_strided_slice %87 {offsets = [0, 0], sizes = [16, 4], strides = [1, 1]} : vector<16x128xf32> to vector<16x4xf32>
    %cst_36 = arith.constant dense<0.000000e+00> : vector<16xf32>
    %91 = vector.multi_reduction <add>, %90, %cst_36 [1] : vector<16x4xf32> to vector<16xf32>
    %92 = vector.shape_cast %91 : vector<16xf32> to vector<16x1xf32>
    %93 = tpu.reciprocal %92 : vector<16x1xf32> -> vector<16x1xf32>
    %94 = vector.broadcast %93 : vector<16x1xf32> to vector<16x4xf32>
    %95 = arith.mulf %90, %94 : vector<16x4xf32>
    %96 = vector.shape_cast %95 : vector<16x4xf32> to vector<16x4x1xf32>
    %97 = vector.broadcast %96 : vector<16x4x1xf32> to vector<16x4x16xf32>
    %98 = arith.mulf %97, %89 : vector<16x4x16xf32>
    %cst_37 = arith.constant dense<0.000000e+00> : vector<16x16xf32>
    %99 = vector.multi_reduction <add>, %98, %cst_37 [1] : vector<16x4x16xf32> to vector<16x16xf32>
    %100 = vector.extract_strided_slice %87 {offsets = [0, 4], sizes = [16, 4], strides = [1, 1]} : vector<16x128xf32> to vector<16x4xf32>
    %cst_38 = arith.constant dense<0.000000e+00> : vector<16xf32>
    %101 = vector.multi_reduction <add>, %100, %cst_38 [1] : vector<16x4xf32> to vector<16xf32>
    %102 = vector.shape_cast %101 : vector<16xf32> to vector<16x1xf32>
    %103 = tpu.reciprocal %102 : vector<16x1xf32> -> vector<16x1xf32>
    %104 = vector.broadcast %103 : vector<16x1xf32> to vector<16x4xf32>
    %105 = arith.mulf %100, %104 : vector<16x4xf32>
    %106 = vector.shape_cast %105 : vector<16x4xf32> to vector<16x4x1xf32>
    %107 = vector.broadcast %106 : vector<16x4x1xf32> to vector<16x4x16xf32>
    %108 = arith.mulf %107, %89 : vector<16x4x16xf32>
    %cst_39 = arith.constant dense<0.000000e+00> : vector<16x16xf32>
    %109 = vector.multi_reduction <add>, %108, %cst_39 [1] : vector<16x4x16xf32> to vector<16x16xf32>
    %110 = tpu.concatenate %99, %109 in 1 : vector<16x16xf32>, vector<16x16xf32> -> vector<16x32xf32>
    %cst_40 = arith.constant 0.000000e+00 : f32
    %111 = vector.broadcast %cst_40 : f32 to vector<16x96xf32>
    %112 = tpu.concatenate %110, %111 in 1 : vector<16x32xf32>, vector<16x96xf32> -> vector<16x128xf32>
    %c0_41 = arith.constant 0 : index
    %c0_42 = arith.constant 0 : index
    %113 = vector.load %arg6[%c0_41, %c0_42] : memref<128x128xbf16, #tpu.memory_space<vmem>>, vector<128x128xbf16>
    %114 = arith.truncf %112 : vector<16x128xf32> to vector<16x128xbf16>
    %cst_43 = arith.constant dense<0.000000e+00> : vector<16x128xf32>
    %115 = tpu.matmul %114, %113, %cst_43 {dimension_numbers = #tpu.dot_dimension_numbers<[1], [0], [0], [1], [0, 0, 1, 1], [], []>} : vector<16x128xbf16>, vector<128x128xbf16>, vector<16x128xf32> -> vector<16x128xf32>
    %c8 = arith.constant 8 : index
    %c0_44 = arith.constant 0 : index
    %116 = vector.load %arg8[%c8, %c0_44] : memref<14x128xf32, #tpu.memory_space<vmem>>, vector<1x128xf32>
    %117 = vector.broadcast %116 : vector<1x128xf32> to vector<16x128xf32>
    %118 = arith.addf %115, %117 : vector<16x128xf32>
    %cst_45 = arith.constant dense<0.000000e+00> : vector<128xf32>
    %119 = vector.multi_reduction <add>, %118, %cst_45 [0] : vector<16x128xf32> to vector<128xf32>
    %120 = vector.shape_cast %119 : vector<128xf32> to vector<1x128xf32>
    %cst_46 = arith.constant 1.600000e+01 : f32
    %121 = vector.broadcast %cst_46 : f32 to vector<1x128xf32>
    %122 = arith.divf %120, %121 : vector<1x128xf32>
    %123 = vector.broadcast %122 : vector<1x128xf32> to vector<16x128xf32>
    %124 = arith.subf %118, %123 : vector<16x128xf32>
    %125 = arith.mulf %124, %124 : vector<16x128xf32>
    %cst_47 = arith.constant dense<0.000000e+00> : vector<128xf32>
    %126 = vector.multi_reduction <add>, %125, %cst_47 [0] : vector<16x128xf32> to vector<128xf32>
    %127 = vector.shape_cast %126 : vector<128xf32> to vector<1x128xf32>
    %cst_48 = arith.constant 1.600000e+01 : f32
    %128 = vector.broadcast %cst_48 : f32 to vector<1x128xf32>
    %129 = arith.divf %127, %128 : vector<1x128xf32>
    %130 = vector.broadcast %122 : vector<1x128xf32> to vector<16x128xf32>
    %131 = arith.subf %118, %130 : vector<16x128xf32>
    %cst_49 = arith.constant 9.99999974E-6 : f32
    %132 = vector.broadcast %cst_49 : f32 to vector<1x128xf32>
    %133 = arith.addf %129, %132 : vector<1x128xf32>
    %134 = math.rsqrt %133 : vector<1x128xf32>
    %135 = vector.broadcast %134 : vector<1x128xf32> to vector<16x128xf32>
    %136 = arith.mulf %131, %135 : vector<16x128xf32>
    %c9 = arith.constant 9 : index
    %c0_50 = arith.constant 0 : index
    %137 = vector.load %arg8[%c9, %c0_50] : memref<14x128xf32, #tpu.memory_space<vmem>>, vector<1x128xf32>
    %138 = vector.broadcast %137 : vector<1x128xf32> to vector<16x128xf32>
    %139 = arith.mulf %136, %138 : vector<16x128xf32>
    %c10 = arith.constant 10 : index
    %c0_51 = arith.constant 0 : index
    %140 = vector.load %arg8[%c10, %c0_51] : memref<14x128xf32, #tpu.memory_space<vmem>>, vector<1x128xf32>
    %141 = vector.broadcast %140 : vector<1x128xf32> to vector<16x128xf32>
    %142 = arith.addf %139, %141 : vector<16x128xf32>
    %cst_52 = arith.constant 0.000000e+00 : f32
    %143 = vector.broadcast %cst_52 : f32 to vector<16x128xf32>
    %144 = arith.cmpf oge, %142, %143 : vector<16x128xf32>
    %cst_53 = arith.constant 0.00999999977 : f32
    %145 = vector.broadcast %cst_53 : f32 to vector<16x128xf32>
    %146 = arith.mulf %145, %142 : vector<16x128xf32>
    %147 = arith.select %144, %142, %146 : vector<16x128xi1>, vector<16x128xf32>
    %c0_54 = arith.constant 0 : index
    %c0_55 = arith.constant 0 : index
    %148 = vector.load %arg7[%c0_54, %c0_55] : memref<128x128xbf16, #tpu.memory_space<vmem>>, vector<128x128xbf16>
    %149 = arith.truncf %147 : vector<16x128xf32> to vector<16x128xbf16>
    %cst_56 = arith.constant dense<0.000000e+00> : vector<16x128xf32>
    %150 = tpu.matmul %149, %148, %cst_56 {dimension_numbers = #tpu.dot_dimension_numbers<[1], [0], [0], [1], [0, 0, 1, 1], [], []>} : vector<16x128xbf16>, vector<128x128xbf16>, vector<16x128xf32> -> vector<16x128xf32>
    %c11 = arith.constant 11 : index
    %c0_57 = arith.constant 0 : index
    %151 = vector.load %arg8[%c11, %c0_57] : memref<14x128xf32, #tpu.memory_space<vmem>>, vector<1x128xf32>
    %152 = vector.broadcast %151 : vector<1x128xf32> to vector<16x128xf32>
    %153 = arith.addf %150, %152 : vector<16x128xf32>
    %cst_58 = arith.constant dense<0.000000e+00> : vector<128xf32>
    %154 = vector.multi_reduction <add>, %153, %cst_58 [0] : vector<16x128xf32> to vector<128xf32>
    %155 = vector.shape_cast %154 : vector<128xf32> to vector<1x128xf32>
    %cst_59 = arith.constant 1.600000e+01 : f32
    %156 = vector.broadcast %cst_59 : f32 to vector<1x128xf32>
    %157 = arith.divf %155, %156 : vector<1x128xf32>
    %158 = vector.broadcast %157 : vector<1x128xf32> to vector<16x128xf32>
    %159 = arith.subf %153, %158 : vector<16x128xf32>
    %160 = arith.mulf %159, %159 : vector<16x128xf32>
    %cst_60 = arith.constant dense<0.000000e+00> : vector<128xf32>
    %161 = vector.multi_reduction <add>, %160, %cst_60 [0] : vector<16x128xf32> to vector<128xf32>
    %162 = vector.shape_cast %161 : vector<128xf32> to vector<1x128xf32>
    %cst_61 = arith.constant 1.600000e+01 : f32
    %163 = vector.broadcast %cst_61 : f32 to vector<1x128xf32>
    %164 = arith.divf %162, %163 : vector<1x128xf32>
    %165 = vector.broadcast %157 : vector<1x128xf32> to vector<16x128xf32>
    %166 = arith.subf %153, %165 : vector<16x128xf32>
    %cst_62 = arith.constant 9.99999974E-6 : f32
    %167 = vector.broadcast %cst_62 : f32 to vector<1x128xf32>
    %168 = arith.addf %164, %167 : vector<1x128xf32>
    %169 = math.rsqrt %168 : vector<1x128xf32>
    %170 = vector.broadcast %169 : vector<1x128xf32> to vector<16x128xf32>
    %171 = arith.mulf %166, %170 : vector<16x128xf32>
    %c12 = arith.constant 12 : index
    %c0_63 = arith.constant 0 : index
    %172 = vector.load %arg8[%c12, %c0_63] : memref<14x128xf32, #tpu.memory_space<vmem>>, vector<1x128xf32>
    %173 = vector.broadcast %172 : vector<1x128xf32> to vector<16x128xf32>
    %174 = arith.mulf %171, %173 : vector<16x128xf32>
    %c13 = arith.constant 13 : index
    %c0_64 = arith.constant 0 : index
    %175 = vector.load %arg8[%c13, %c0_64] : memref<14x128xf32, #tpu.memory_space<vmem>>, vector<1x128xf32>
    %176 = vector.broadcast %175 : vector<1x128xf32> to vector<16x128xf32>
    %177 = arith.addf %174, %176 : vector<16x128xf32>
    %cst_65 = arith.constant 0.000000e+00 : f32
    %178 = vector.broadcast %cst_65 : f32 to vector<16x128xf32>
    %179 = arith.cmpf oge, %177, %178 : vector<16x128xf32>
    %cst_66 = arith.constant 0.00999999977 : f32
    %180 = vector.broadcast %cst_66 : f32 to vector<16x128xf32>
    %181 = arith.mulf %180, %177 : vector<16x128xf32>
    %182 = arith.select %179, %177, %181 : vector<16x128xi1>, vector<16x128xf32>
    %c0_67 = arith.constant 0 : index
    %c0_68 = arith.constant 0 : index
    %183 = vector.load %arg9[%c0_67, %c0_68] : memref<16x128xf32, #tpu.memory_space<vmem>>, vector<16x128xf32>
    tpu.vector_store %arg9[%c0_67, %c0_68], %182 {strides = array<i32>} : memref<16x128xf32, #tpu.memory_space<vmem>>, vector<16x128xf32>,
    return
  }
  func.func @transform_0(%arg0: i32) -> (i32, i32) {
    %c0_i32 = arith.constant 0 : i32
    %c0_i32_0 = arith.constant 0 : i32
    return %arg0, %c0_i32 : i32, i32
  }
  func.func @transform_1(%arg0: i32) -> (i32, i32) {
    %c0_i32 = arith.constant 0 : i32
    %c0_i32_0 = arith.constant 0 : i32
    %c0_i32_1 = arith.constant 0 : i32
    return %c0_i32, %c0_i32_0 : i32, i32
  }
  func.func @transform_2(%arg0: i32) -> (i32, i32) {
    %c0_i32 = arith.constant 0 : i32
    %c0_i32_0 = arith.constant 0 : i32
    %c0_i32_1 = arith.constant 0 : i32
    return %c0_i32, %c0_i32_0 : i32, i32
  }
  func.func @transform_3(%arg0: i32) -> (i32, i32) {
    %c0_i32 = arith.constant 0 : i32
    %c0_i32_0 = arith.constant 0 : i32
    %c0_i32_1 = arith.constant 0 : i32
    return %c0_i32, %c0_i32_0 : i32, i32
  }
  func.func @transform_4(%arg0: i32) -> (i32, i32) {
    %c0_i32 = arith.constant 0 : i32
    %c0_i32_0 = arith.constant 0 : i32
    %c0_i32_1 = arith.constant 0 : i32
    return %c0_i32, %c0_i32_0 : i32, i32
  }
  func.func @transform_5(%arg0: i32) -> (i32, i32) {
    %c0_i32 = arith.constant 0 : i32
    %c0_i32_0 = arith.constant 0 : i32
    %c0_i32_1 = arith.constant 0 : i32
    return %c0_i32, %c0_i32_0 : i32, i32
  }
  func.func @transform_6(%arg0: i32) -> (i32, i32) {
    %c0_i32 = arith.constant 0 : i32
    %c0_i32_0 = arith.constant 0 : i32
    %c0_i32_1 = arith.constant 0 : i32
    return %c0_i32, %c0_i32_0 : i32, i32
  }
  func.func @transform_7(%arg0: i32) -> (i32, i32) {
    %c0_i32 = arith.constant 0 : i32
    %c0_i32_0 = arith.constant 0 : i32
    %c0_i32_1 = arith.constant 0 : i32
    return %c0_i32, %c0_i32_0 : i32, i32
  }
  func.func @transform_8(%arg0: i32) -> (i32, i32) {
    %c0_i32 = arith.constant 0 : i32
    %c0_i32_0 = arith.constant 0 : i32
    return %arg0, %c0_i32 : i32, i32
  }
}

</mosaic_0001>

<bundles_post_ra>
// kernel: tpu_custom_call.1
= control target key start
LH: loop header
LB: loop body
LE: loop exit
PB: predicated region body
PF: predicated region fallthrough
CT: control target
= control target key end

     0   :  { %13 = vsyncpa [#allocation3], 0  ;;  %s2695_s0 = inlined_call_operand.hbm [shape: f32[16,128], index: 0, kind: input, shape index: {}]   ;;  %s2696_s1 = inlined_call_operand.hbm [shape: bf16[128,128], index: 1, kind: input, shape index: {}]   ;;  %s2697_s2 = inlined_call_operand.hbm [shape: bf16[128,128], index: 2, kind: input, shape index: {}]   ;;  %s2698_s3 = inlined_call_operand.hbm [shape: bf16[128,128], index: 3, kind: input, shape index: {}]   ;;  %s2699_s4 = inlined_call_operand.hbm [shape: bf16[128,128], index: 4, kind: input, shape index: {}]   ;;  %s2700_s5 = inlined_call_operand.hbm [shape: bf16[128,128], index: 5, kind: input, shape index: {}]   ;;  %s2701_s6 = inlined_call_operand.hbm [shape: bf16[128,128], index: 6, kind: input, shape index: {}]   ;;  %s2702_s7 = inlined_call_operand.hbm [shape: f32[14,128], index: 7, kind: input, shape index: {}]   ;;  %s2703_s8 = inlined_call_operand.hbm [shape: f32[16,128], index: 8, kind: output, shape index: {}]  }
   0x1   :  { %14 = vsyncpa [#allocation6], 0 }
   0x2   :  { %15 = vsyncpa [#allocation9], 0 }
   0x3   :  { %16 = vsyncpa [#allocation12], 0 }
   0x4   :  { %17 = vsyncpa [#allocation15], 0 }
   0x5   :  { %18 = vsyncpa [#allocation4], 0  ;;  %s2306_s27 = smov [#allocation5]  }
   0x6   :  { %s36_s28 = sshll.u32 %s2306_s27, 4  ;;  %s37_s28 = int_to_ptr.vmem [resolvable:$true] %s36_s28 }
   0x7   :  { %s2122_s29 = scalar_lea.vmem %s37_s28, 1024  ;;  %p2127_p1 = scmp.lt.s32.totalorder %s37_s28, %s37_s28 }
   0x8   :  { %p2123_p0 = scmp.ne.s32.totalorder %s37_s28, %s2122_s29  ;;  %p2128_p2 = scmp.lt.s32.totalorder %s2122_s29, %s2122_s29 }
   0xa   :  { %p2129_p3 = por %p2128_p2, %p2127_p1 }
   0xc   :  { %p2130_p4 = pnand %p2129_p3, %p2123_p0 }
   0xe   :  { %2133 = shalt.err (!%p2130_p4)
}
   0xf   :  { %s2307_s30 = smov 64   ;;  %s2308_s9 = smov 4  }
  0x10   :  { %42 = dma.hbm_to_vmem [thread:$0]  %s2696_s1, 1024, %s37_s28, [#allocation6], %s2307_s30, %s2307_s30, %s2308_s9  }
  0x11   :  { %s2309_s12 = smov [#allocation8]   ;;  %s2310_s14 = smov [#allocation11]  }
  0x12   :  { %s60_s13 = sshll.u32 %s2309_s12, 4  ;;  %s84_s15 = sshll.u32 %s2310_s14, 4  ;;  %s61_s13 = int_to_ptr.vmem [resolvable:$true] %s60_s13  ;;  %s85_s15 = int_to_ptr.vmem [resolvable:$true] %s84_s15 }
  0x13   :  { %s2142_s16 = scalar_lea.vmem %s61_s13, 1024  ;;  %p2147_p6 = scmp.lt.s32.totalorder %s61_s13, %s61_s13 }
  0x14   :  { %p2143_p5 = scmp.ne.s32.totalorder %s61_s13, %s2142_s16  ;;  %p2148_p7 = scmp.lt.s32.totalorder %s2142_s16, %s2142_s16 }
  0x16   :  { %p2149_p8 = por %p2148_p7, %p2147_p6 }
  0x18   :  { %p2150_p9 = pnand %p2149_p8, %p2143_p5 }
  0x1a   :  { %2153 = shalt.err (!%p2150_p9)
}
  0x1b   :  { %66 = dma.hbm_to_vmem [thread:$0]  %s2698_s3, 1024, %s61_s13, [#allocation9], %s2307_s30, %s2307_s30, %s2308_s9  }
  0x1c   :  { %s2162_s1 = scalar_lea.vmem %s85_s15, 1024  ;;  %p2167_p11 = scmp.lt.s32.totalorder %s85_s15, %s85_s15 }
  0x1d   :  { %p2163_p10 = scmp.ne.s32.totalorder %s85_s15, %s2162_s1  ;;  %p2168_p12 = scmp.lt.s32.totalorder %s2162_s1, %s2162_s1 }
  0x1f   :  { %p2169_p13 = por %p2168_p12, %p2167_p11 }
  0x21   :  { %p2170_p0 = pnand %p2169_p13, %p2163_p10 }
  0x23   :  { %2173 = shalt.err (!%p2170_p0)
}
  0x24   :  { %90 = dma.hbm_to_vmem [thread:$0]  %s2700_s5, 1024, %s85_s15, [#allocation12], %s2307_s30, %s2307_s30, %s2308_s9  }
  0x25   :  { %s2311_s21 = smov [#allocation2]  }
  0x26   :  { %s24_s22 = sshll.u32 %s2311_s21, 4  ;;  %s25_s22 = int_to_ptr.vmem [resolvable:$true] %s24_s22 }
  0x27   :  { %s2182_s23 = scalar_lea.vmem %s25_s22, 256  ;;  %p2187_p2 = scmp.lt.s32.totalorder %s25_s22, %s25_s22 }
  0x28   :  { %p2183_p1 = scmp.ne.s32.totalorder %s25_s22, %s2182_s23  ;;  %p2188_p3 = scmp.lt.s32.totalorder %s2182_s23, %s2182_s23 }
  0x2a   :  { %p2189_p4 = por %p2188_p3, %p2187_p2 }
  0x2c   :  { %p2190_p5 = pnand %p2189_p4, %p2183_p1 }
  0x2e   :  { %2193 = shalt.err (!%p2190_p5)
}
  0x2f   :  { %s2312_s3 = smov 128   ;;  %s2313_s24 = smov 8  }
  0x30   :  { %30 = dma.hbm_to_vmem [thread:$0]  %s2695_s0, 256, %s25_s22, [#allocation3], %s2312_s3, %s2312_s3, %s2313_s24  }
  0x31   :  { %s2314_s5 = smov [#allocation7]   ;;  %s2315_s28 = smov [#allocation10]  }
  0x32   :  { %s48_s27 = sshll.u32 %s2314_s5, 4  ;;  %s72_s29 = sshll.u32 %s2315_s28, 4  ;;  %s49_s27 = int_to_ptr.vmem [resolvable:$true] %s48_s27  ;;  %s73_s29 = int_to_ptr.vmem [resolvable:$true] %s72_s29 }
  0x33   :  { %s2202_s10 = scalar_lea.vmem %s49_s27, 1024  ;;  %p2207_p7 = scmp.lt.s32.totalorder %s49_s27, %s49_s27 }
  0x34   :  { %p2203_p6 = scmp.ne.s32.totalorder %s49_s27, %s2202_s10  ;;  %p2208_p8 = scmp.lt.s32.totalorder %s2202_s10, %s2202_s10 }
  0x36   :  { %p2209_p9 = por %p2208_p8, %p2207_p7 }
  0x38   :  { %p2210_p10 = pnand %p2209_p9, %p2203_p6 }
  0x3a   :  { %2213 = shalt.err (!%p2210_p10)
}
  0x3b   :  { %54 = dma.hbm_to_vmem [thread:$0]  %s2697_s2, 1024, %s49_s27, [#allocation6], %s2307_s30, %s2307_s30, %s2308_s9  }
  0x3c   :  { %s2222_s0 = scalar_lea.vmem %s73_s29, 1024  ;;  %p2227_p12 = scmp.lt.s32.totalorder %s73_s29, %s73_s29 }
  0x3d   :  { %p2223_p11 = scmp.ne.s32.totalorder %s73_s29, %s2222_s0  ;;  %p2228_p13 = scmp.lt.s32.totalorder %s2222_s0, %s2222_s0 }
  0x3f   :  { %p2229_p0 = por %p2228_p13, %p2227_p12 }
  0x41   :  { %p2230_p1 = pnand %p2229_p0, %p2223_p11 }
  0x43   :  { %2233 = shalt.err (!%p2230_p1)
}
  0x44   :  { %78 = dma.hbm_to_vmem [thread:$0]  %s2699_s4, 1024, %s73_s29, [#allocation9], %s2307_s30, %s2307_s30, %s2308_s9  }
  0x45   :  { %s2316_s15 = smov [#allocation13]   ;;  %s2317_s17 = smov [#allocation14]  }
  0x46   :  { %s96_s16 = sshll.u32 %s2316_s15, 4  ;;  %s108_s18 = sshll.u32 %s2317_s17, 4  ;;  %s97_s16 = int_to_ptr.vmem [resolvable:$true] %s96_s16  ;;  %s109_s18 = int_to_ptr.vmem [resolvable:$true] %s108_s18 }
  0x47   :  { %s2242_s2 = scalar_lea.vmem %s97_s16, 1024  ;;  %p2247_p3 = scmp.lt.s32.totalorder %s97_s16, %s97_s16 }
  0x48   :  { %p2243_p2 = scmp.ne.s32.totalorder %s97_s16, %s2242_s2  ;;  %p2248_p4 = scmp.lt.s32.totalorder %s2242_s2, %s2242_s2 }
  0x4a   :  { %p2249_p5 = por %p2248_p4, %p2247_p3 }
  0x4c   :  { %p2250_p6 = pnand %p2249_p5, %p2243_p2 }
  0x4e   :  { %2253 = shalt.err (!%p2250_p6)
}
  0x4f   :  { %102 = dma.hbm_to_vmem [thread:$0]  %s2701_s6, 1024, %s97_s16, [#allocation12], %s2307_s30, %s2307_s30, %s2308_s9  }
  0x50   :  { %s2262_s4 = scalar_lea.vmem %s109_s18, 256  ;;  %p2267_p8 = scmp.lt.s32.totalorder %s109_s18, %s109_s18 }
  0x51   :  { %p2263_p7 = scmp.ne.s32.totalorder %s109_s18, %s2262_s4  ;;  %p2268_p9 = scmp.lt.s32.totalorder %s2262_s4, %s2262_s4 }
  0x53   :  { %p2269_p10 = por %p2268_p9, %p2267_p8 }
  0x55   :  { %p2270_p11 = pnand %p2269_p10, %p2263_p7 }
  0x57   :  { %2273 = shalt.err (!%p2270_p11)
}
  0x58   :  { %114 = dma.hbm_to_vmem [thread:$0]  %s2702_s7, 256, %s109_s18, [#allocation15], %s2312_s3, %s2312_s3, %s2313_s24  }
  0x59   :  { %2294 = dma.done.wait [#allocation3], 256  }
  0x5a   :  { %2295 = vsyncadd [#allocation3], 4294967040 }
  0x5b   :  { %2296 = dma.done.wait [#allocation6], 2048  }
  0x5c   :  { %2297 = vsyncadd [#allocation6], 4294965248 }
  0x5d   :  { %2298 = dma.done.wait [#allocation9], 2048  }
  0x5e   :  { %2299 = vsyncadd [#allocation9], 4294965248 }
  0x5f   :  { %2300 = dma.done.wait [#allocation12], 2048  }
  0x60   :  { %2301 = vsyncadd [#allocation12], 4294965248 }
  0x61   :  { %2302 = dma.done.wait [#allocation15], 256  }
  0x62   :  { %2303 = vsyncadd [#allocation15], 4294967040  ;;  %v2318_v0 = vmov 0.0   ;;  %vm2319_vm0 = vmmov 0   ;;  %v2046_v1 = vld [vmem:[#allocation5 + $0x38] sm:$0xff]   ;;  %v2047_v2 = vld [vmem:[#allocation5 + $0x30] sm:$0xff]  }
  0x63   :  { %1899 = vmatprep.subr.bf16.mxu0 %v2318_v0  ;;  %1915 = vmatprep.mubr.msk.bf16.mxu0 %vm2319_vm0, %v2318_v0  ;;  %v2048_v3 = vld [vmem:[#allocation5 + $0x28] sm:$0xff]   ;;  %v2049_v4 = vld [vmem:[#allocation5 + $0x20] sm:$0xff]   ;;  %v2050_v5 = vld [vmem:[#allocation5 + $0x18] sm:$0xff]   ;;  %s2320_s6 = smov 124   ;;  %vm840_vm5 = vcmask 31744   ;;  %s2321_s7 = smov 96  }
  0x64   :  { %1919 = vmatprep.subr.bf16.mxu1 %v2318_v0  ;;  %1935 = vmatprep.mubr.msk.bf16.mxu1 %vm2319_vm0, %v2318_v0  ;;  %v2051_v6 = vld [vmem:[#allocation5 + $0x10] sm:$0xff]   ;;  %v2052_v7 = vld [vmem:[#allocation5 + $0x8] sm:$0xff]   ;;  %v2053_v8 = vld [vmem:[#allocation5] sm:$0xff]   ;;  %s2322_s30 = smov 112   ;;  %s2323_s9 = smov 80   ;;  %vm979_vm6 = vcmask 125952  }
  0x65   :  { %1900 = vmatpush3.bf16.msra.mxu0 %v2046_v1  ;;  %v140_v9 = vld [vmem:[#allocation2] sm:$0xff]  ;;  %v141_v10 = vld [vmem:[#allocation2 + $0x8] sm:$0xff]  ;;  %v2056_v14 = vld [vmem:[#allocation7 + $0x28] sm:$0xff]   ;;  %vm1382_vm7 = vcmask 1041409   ;;  %vm1384_vm8 = vcmask 1042434   ;;  %vm1386_vm9 = vcmask 1043459  }
  0x66   :  { %1901 = vmatprep.subr.bf16.mxu0 %v2318_v0  ;;  %v158_v11 = vpack.c.bf16 %v141_v10, %v140_v9  ;;  %v2054_v12 = vld [vmem:[#allocation7 + $0x38] sm:$0xff]   ;;  %v2055_v13 = vld [vmem:[#allocation7 + $0x30] sm:$0xff]   ;;  %v2057_v15 = vld [vmem:[#allocation7 + $0x20] sm:$0xff]   ;;  %vm1388_vm10 = vcmask 1044484   ;;  %vm1390_vm11 = vcmask 1045509   ;;  %vm1392_vm12 = vcmask 1046534  }
  0x67   :  { %1920 = vmatpush3.bf16.msra.mxu1 %v2054_v12  ;;  %v2058_v16 = vld [vmem:[#allocation7 + $0x18] sm:$0xff]   ;;  %v2059_v17 = vld [vmem:[#allocation7 + $0x10] sm:$0xff]   ;;  %v2060_v18 = vld [vmem:[#allocation7 + $0x8] sm:$0xff]   ;;  %vm1394_vm13 = vcmask 1047559   ;;  %s2326_s22 = smov 16   ;;  %vm1441_vm14 = vcmask 130048  }
  0x68   :  { %1921 = vmatprep.subr.bf16.mxu1 %v2318_v0  ;;  %v2061_v19 = vld [vmem:[#allocation7] sm:$0xff]   ;;  %v2062_v61 = vld [vmem:[#allocation10 + $0x38] sm:$0xff]   ;;  %v2063_v63 = vld [vmem:[#allocation10 + $0x30] sm:$0xff]   ;;  %vm1444_vm15 = vcmask 261120   ;;  %s2327_s23 = smov [#allocation16]  }
  0x69   :  { %1902 = vmatpush3.bf16.msra.mxu0 %v2047_v2  ;;  %v1780_v21 = vld [vmem:[#allocation14] ss:$0 sm:$0xff]  ;;  %v1789_v49 = vld [vmem:[#allocation14 + $0x1] ss:$0 sm:$0xff]  ;;  %v1790_v52 = vld [vmem:[#allocation14 + $0x2] ss:$0 sm:$0xff] }
  0x6a   :  { %1903 = vmatprep.subr.bf16.mxu0 %v2318_v0  ;;  %v2064_v1 = vld [vmem:[#allocation10 + $0x28] sm:$0xff]   ;;  %v2065_v2 = vld [vmem:[#allocation10 + $0x20] sm:$0xff]   ;;  %v2075_v12 = vld [vmem:[#allocation8 + $0x10] sm:$0xff]   ;;  %s1764_s25 = sshll.u32 %s2327_s23, 4  ;;  %s1765_s25 = int_to_ptr.vmem [resolvable:$true] %s1764_s25 }
  0x6b   :  { %1922 = vmatpush3.bf16.msra.mxu1 %v2055_v13  ;;  %v2072_v9 = vld [vmem:[#allocation8 + $0x28] sm:$0xff]   ;;  %v2073_v10 = vld [vmem:[#allocation8 + $0x20] sm:$0xff]   ;;  %s2274_s26 = scalar_lea.vmem %s1765_s25, 256  ;;  %p2279_p13 = scmp.lt.s32.totalorder %s1765_s25, %s1765_s25 }
  0x6c   :  { %1923 = vmatprep.subr.bf16.mxu1 %v2318_v0  ;;  %v2076_v13 = vld [vmem:[#allocation8 + $0x8] sm:$0xff]   ;;  %p2275_p12 = scmp.ne.s32.totalorder %s1765_s25, %s2274_s26  ;;  %p2280_p0 = scmp.lt.s32.totalorder %s2274_s26, %s2274_s26 }
  0x6d   :  { %1904 = vmatpush3.bf16.msra.mxu0 %v2048_v3  ;;  %v2066_v3 = vld [vmem:[#allocation10 + $0x18] sm:$0xff]  }
  0x6e   :  { %1905 = vmatprep.subr.bf16.mxu0 %v2318_v0  ;;  %p2281_p1 = por %p2280_p0, %p2279_p13 }
  0x6f   :  { %1924 = vmatpush3.bf16.msra.mxu1 %v2056_v14  ;;  %v2077_v14 = vld [vmem:[#allocation8] sm:$0xff]  }
  0x70   :  { %1925 = vmatprep.subr.bf16.mxu1 %v2318_v0  ;;  %p2282_p2 = pnand %p2281_p1, %p2275_p12 }
  0x71   :  { %1906 = vmatpush3.bf16.msra.mxu0 %v2049_v4  ;;  %v2067_v4 = vld [vmem:[#allocation10 + $0x10] sm:$0xff]  }
  0x72   :  { %1907 = vmatprep.subr.bf16.mxu0 %v2318_v0 }
  0x73   :  { %1926 = vmatpush3.bf16.msra.mxu1 %v2057_v15 }
  0x74   :  { %1927 = vmatprep.subr.bf16.mxu1 %v2318_v0 }
  0x75   :  { %1908 = vmatpush3.bf16.msra.mxu0 %v2050_v5  ;;  %v2068_v5 = vld [vmem:[#allocation10 + $0x8] sm:$0xff]  }
  0x76   :  { %1909 = vmatprep.subr.bf16.mxu0 %v2318_v0 }
  0x77   :  { %1928 = vmatpush3.bf16.msra.mxu1 %v2058_v16  ;;  %v1791_v16 = vld [vmem:[#allocation14 + $0x3] ss:$0 sm:$0xff] }
  0x78   :  { %1929 = vmatprep.subr.bf16.mxu1 %v2318_v0 }
  0x79   :  { %1910 = vmatpush3.bf16.msra.mxu0 %v2051_v6  ;;  %v2069_v6 = vld [vmem:[#allocation10] sm:$0xff]  }
  0x7a   :  { %1911 = vmatprep.subr.bf16.mxu0 %v2318_v0 }
  0x7b   :  { %1930 = vmatpush3.bf16.msra.mxu1 %v2059_v17 }
  0x7c   :  { %1931 = vmatprep.subr.bf16.mxu1 %v2318_v0 }
  0x7d   :  { %1912 = vmatpush3.bf16.msra.mxu0 %v2052_v7  ;;  %v2070_v7 = vld [vmem:[#allocation8 + $0x38] sm:$0xff]  }
  0x7e   :  { %1913 = vmatprep.subr.bf16.mxu0 %v2318_v0 }
  0x7f   :  { %1932 = vmatpush3.bf16.msra.mxu1 %v2060_v18 }
  0x80   :  { %1933 = vmatprep.subr.bf16.mxu1 %v2318_v0 }
  0x81   :  { %1914 = vmatpush3.bf16.msra.mxu0 %v2053_v8  ;;  %v2071_v8 = vld [vmem:[#allocation8 + $0x30] sm:$0xff]  }
  0x82   :  { %1939 = vmatprep.subr.bf16.mxu0 %v2318_v0 }
  0x83   :  { %1934 = vmatpush3.bf16.msra.mxu1 %v2061_v19 }
  0x84   :  { %1916 = vmatmul.mubr.bf16.vlgmr.msra.gmra.mxu0 %v158_v11  ;;  %1959 = vmatprep.subr.bf16.mxu1 %v2318_v0  ;;  %v2074_v11 = vld [vmem:[#allocation8 + $0x18] sm:$0xff]  }
  0x85   :  { %1955 = vmatprep.mubr.msk.bf16.mxu0 %vm2319_vm0, %v2318_v0  ;;  %1940 = vmatpush3.bf16.msra.mxu0 %v2070_v7 }
  0x86   :  { %1941 = vmatprep.subr.bf16.mxu0 %v2318_v0 }
  0x89   :  { %1942 = vmatpush3.bf16.msra.mxu0 %v2071_v8 }
  0x8a   :  { %1943 = vmatprep.subr.bf16.mxu0 %v2318_v0 }
  0x8d   :  { %1944 = vmatpush3.bf16.msra.mxu0 %v2072_v9 }
  0x8e   :  { %1945 = vmatprep.subr.bf16.mxu0 %v2318_v0 }
  0x91   :  { %1946 = vmatpush3.bf16.msra.mxu0 %v2073_v10 }
  0x92   :  { %1947 = vmatprep.subr.bf16.mxu0 %v2318_v0 }
  0x95   :  { %1948 = vmatpush3.bf16.msra.mxu0 %v2074_v11 }
  0x96   :  { %1949 = vmatprep.subr.bf16.mxu0 %v2318_v0 }
  0x99   :  { %1950 = vmatpush3.bf16.msra.mxu0 %v2075_v12 }
  0x9a   :  { %1951 = vmatprep.subr.bf16.mxu0 %v2318_v0 }
  0x9d   :  { %1952 = vmatpush3.bf16.msra.mxu0 %v2076_v13 }
  0x9e   :  { %1953 = vmatprep.subr.bf16.mxu0 %v2318_v0 }
  0xa1   :  { %1954 = vmatpush3.bf16.msra.mxu0 %v2077_v14 }
  0xa2   :  { %1979 = vmatprep.subr.bf16.mxu0 %v2318_v0 }
 0x144   :  { %v246_v20 = vpop.f32.mrf.mxu0 }
 0x145   :  { %v247_v24 = vadd.f32 %v1780_v21, %v246_v20 }
 0x146   :  { %v1917_v22 = vpop.f32.mrf.mxu0 }
 0x148   :  { %v249_v23 = vpop.f32.mrf.mxu0 }
 0x149   :  { %v250_v25 = vadd.f32 %v1780_v21, %v249_v23 }
 0x14a   :  { %v1918_v26 = vpop.f32.mrf.mxu0 }
 0x14b   :  { %v253_v27 = vadd.f32 %v250_v25, %v247_v24 }
 0x14d   :  { %v254_v28 = vrot.slane %v253_v27, 4 }
 0x14f   :  { %v255_v29 = vadd.f32 %v254_v28, %v253_v27 }
 0x151   :  { %v256_v30 = vrot.slane %v255_v29, 2 }
 0x153   :  { %v257_v31 = vadd.f32 %v256_v30, %v255_v29 }
 0x155   :  { %v258_v32 = vrot.slane %v257_v31, 1 }
 0x157   :  { %v259_v33 = vadd.f32 %v258_v32, %v257_v31 }
 0x159   :  { %v261_v34 = vmul.f32 0.0625, %v259_v33 }
 0x15b   :  { %v262_v35 = vsub.f32 %v247_v24, %v261_v34  ;;  %v263_v36 = vsub.f32 %v250_v25, %v261_v34 }
 0x15d   :  { %v264_v37 = vmul.f32 %v262_v35, %v262_v35  ;;  %v265_v38 = vmul.f32 %v263_v36, %v263_v36 }
 0x15f   :  { %v266_v39 = vadd.f32 %v265_v38, %v264_v37 }
 0x161   :  { %v267_v40 = vrot.slane %v266_v39, 4 }
 0x163   :  { %v268_v41 = vadd.f32 %v267_v40, %v266_v39 }
 0x165   :  { %v269_v42 = vrot.slane %v268_v41, 2 }
 0x167   :  { %v270_v43 = vadd.f32 %v269_v42, %v268_v41 }
 0x169   :  { %v271_v44 = vrot.slane %v270_v43, 1 }
 0x16b   :  { %v272_v45 = vadd.f32 %v271_v44, %v270_v43 }
 0x16d   :  { %v273_v46 = vmul.f32 0.0625, %v272_v45 }
 0x16f   :  { %v274_v47 = vadd.f32 1e-05, %v273_v46 }
 0x171   :  { %2094 = vrsqrt.f32 %v274_v47 }
 0x17e   :  { %v2095_v48 = vpop.eup %2094 }
 0x17f   :  { %v276_v50 = vmul.f32 %v2095_v48, %v262_v35  ;;  %v277_v51 = vmul.f32 %v2095_v48, %v263_v36  ;;  %v1811_v36 = vld [vmem:[#allocation14 + $0x7] ss:$0 sm:$0xff] }
 0x181   :  { %v283_v53 = vmul.f32 %v1789_v49, %v276_v50  ;;  %v284_v54 = vmul.f32 %v1789_v49, %v277_v51  ;;  %v1800_v51 = vld [vmem:[#allocation14 + $0x4] ss:$0 sm:$0xff] }
 0x183   :  { %v291_v55 = vadd.f32 %v1790_v52, %v284_v54  ;;  %v290_v56 = vadd.f32 %v1790_v52, %v283_v53  ;;  %v1801_v54 = vld [vmem:[#allocation14 + $0x5] ss:$0 sm:$0xff] }
 0x185   :  { %vm292_vm1 = vcmp.ge.f32.partialorder %v290_v56, 0.0  ;;  %vm293_vm2 = vcmp.ge.f32.partialorder %v291_v55, 0.0  ;;  %v294_v57 = vmul.f32 0.01, %v290_v56  ;;  %v295_v58 = vmul.f32 0.01, %v291_v55 }
 0x187   :  { %v296_v59 = vsel %vm292_vm1, %v290_v56, %v294_v57  ;;  %v297_v60 = vsel %vm293_vm2, %v291_v55, %v295_v58 }
 0x188   :  { %v314_v62 = vpack.c.bf16 %v297_v60, %v296_v59 }
 0x18a   :  { %1936 = vmatmul.mubr.bf16.vlgmr.msra.gmra.mxu1 %v314_v62 }
 0x18b   :  { %1960 = vmatpush3.bf16.msra.mxu1 %v2062_v61  ;;  %1975 = vmatprep.mubr.msk.bf16.mxu1 %vm2319_vm0, %v2318_v0 }
 0x18c   :  { %1961 = vmatprep.subr.bf16.mxu1 %v2318_v0 }
 0x18f   :  { %1962 = vmatpush3.bf16.msra.mxu1 %v2063_v63 }
 0x190   :  { %1963 = vmatprep.subr.bf16.mxu1 %v2318_v0 }
 0x193   :  { %1964 = vmatpush3.bf16.msra.mxu1 %v2064_v1 }
 0x194   :  { %1965 = vmatprep.subr.bf16.mxu1 %v2318_v0 }
 0x197   :  { %1966 = vmatpush3.bf16.msra.mxu1 %v2065_v2 }
 0x198   :  { %1967 = vmatprep.subr.bf16.mxu1 %v2318_v0 }
 0x19b   :  { %1968 = vmatpush3.bf16.msra.mxu1 %v2066_v3 }
 0x19c   :  { %1969 = vmatprep.subr.bf16.mxu1 %v2318_v0 }
 0x19f   :  { %1970 = vmatpush3.bf16.msra.mxu1 %v2067_v4 }
 0x1a0   :  { %1971 = vmatprep.subr.bf16.mxu1 %v2318_v0 }
 0x1a3   :  { %1972 = vmatpush3.bf16.msra.mxu1 %v2068_v5 }
 0x1a4   :  { %1973 = vmatprep.subr.bf16.mxu1 %v2318_v0 }
 0x1a7   :  { %1974 = vmatpush3.bf16.msra.mxu1 %v2069_v6 }
 0x1a8   :  { %1999 = vmatprep.subr.bf16.mxu1 %v2318_v0 }
 0x1aa   :  { %1976 = vmatmul.mubr.bf16.vlgmr.msra.gmra.mxu1 %v314_v62 }
 0x1ab   :  { %2015 = vmatprep.mubr.msk.bf16.mxu1 %vm2319_vm0, %v2318_v0 }
 0x24a   :  { %v402_v15 = vpop.f32.mrf.mxu1 }
 0x24b   :  { %v403_v19 = vadd.f32 %v1791_v16, %v402_v15 }
 0x24c   :  { %v1937_v17 = vpop.f32.mrf.mxu1 }
 0x24e   :  { %v405_v18 = vpop.f32.mrf.mxu1 }
 0x24f   :  { %v406_v20 = vadd.f32 %v1791_v16, %v405_v18 }
 0x250   :  { %v1938_v21 = vpop.f32.mrf.mxu1 }
 0x251   :  { %v409_v22 = vadd.f32 %v406_v20, %v403_v19 }
 0x253   :  { %v410_v23 = vrot.slane %v409_v22, 4 }
 0x255   :  { %v411_v24 = vadd.f32 %v410_v23, %v409_v22 }
 0x257   :  { %v412_v25 = vrot.slane %v411_v24, 2 }
 0x259   :  { %v413_v26 = vadd.f32 %v412_v25, %v411_v24  ;;  %v709_v24 = vlaneseq }
 0x25b   :  { %v414_v27 = vrot.slane %v413_v26, 1  ;;  %v2485_v25 = vshrl.u32 %v709_v24, 7  ;;  %v2084_v24 = vld [vmem:[#allocation11 + $0x8] sm:$0xff]  }
 0x25d   :  { %v415_v28 = vadd.f32 %v414_v27, %v413_v26  ;;  %v860_v26 = vsub.s32 1, %v2485_v25  ;;  %v853_v27 = vsub.s32 0, %v2485_v25 }
 0x25f   :  { %v416_v29 = vmul.f32 0.0625, %v415_v28 }
 0x261   :  { %v417_v30 = vsub.f32 %v403_v19, %v416_v29  ;;  %v418_v31 = vsub.f32 %v406_v20, %v416_v29  ;;  %v1802_v19 = vld [vmem:[#allocation14 + $0x6] ss:$0 sm:$0xff] }
 0x263   :  { %v419_v32 = vmul.f32 %v417_v30, %v417_v30  ;;  %v420_v33 = vmul.f32 %v418_v31, %v418_v31 }
 0x265   :  { %v421_v34 = vadd.f32 %v420_v33, %v419_v32  ;;  %v867_v32 = vsub.s32 2, %v2485_v25 }
 0x267   :  { %v422_v35 = vrot.slane %v421_v34, 4 }
 0x269   :  { %v423_v37 = vadd.f32 %v422_v35, %v421_v34 }
 0x26a   :  { %v667_v38 = vpop.f32.mrf.mxu1 }
 0x26b   :  { %v424_v39 = vrot.slane %v423_v37, 2  ;;  %v668_v40 = vadd.f32 %v1811_v36, %v667_v38 }
 0x26c   :  { %v1977_v41 = vpop.f32.mrf.mxu1 }
 0x26d   :  { %v425_v42 = vadd.f32 %v424_v39, %v423_v37  ;;  %674 = vmax.xlane.f32.xlu0 %v668_v40  ;;  %v874_v37 = vsub.s32 3, %v2485_v25  ;;  %v881_v41 = vsub.s32 4, %v2485_v25 }
 0x26e   :  { %v670_v43 = vpop.f32.mrf.mxu1 }
 0x26f   :  { %v426_v44 = vrot.slane %v425_v42, 1  ;;  %v671_v45 = vadd.f32 %v1811_v36, %v670_v43 }
 0x270   :  { %v1978_v46 = vpop.f32.mrf.mxu1 }
 0x271   :  { %v427_v47 = vadd.f32 %v426_v44, %v425_v42  ;;  %676 = vmax.xlane.f32.xlu0 %v671_v45  ;;  %v888_v44 = vsub.s32 5, %v2485_v25 }
 0x273   :  { %v428_v48 = vmul.f32 0.0625, %v427_v47 }
 0x275   :  { %v429_v49 = vadd.f32 1e-05, %v428_v48 }
 0x277   :  { %2096 = vrsqrt.f32 %v429_v49 }
 0x284   :  { %v2097_v50 = vpop.eup %2096 }
 0x285   :  { %v431_v52 = vmul.f32 %v2097_v50, %v417_v30  ;;  %v432_v53 = vmul.f32 %v2097_v50, %v418_v31  ;;  %v895_v50 = vsub.s32 6, %v2485_v25 }
 0x287   :  { %v438_v55 = vmul.f32 %v1800_v51, %v431_v52  ;;  %v439_v56 = vmul.f32 %v1800_v51, %v432_v53  ;;  %v902_v53 = vsub.s32 7, %v2485_v25 }
 0x289   :  { %v445_v57 = vadd.f32 %v1801_v54, %v438_v55  ;;  %v446_v58 = vadd.f32 %v1801_v54, %v439_v56 }
 0x28b   :  { %vm447_vm3 = vcmp.ge.f32.partialorder %v445_v57, 0.0  ;;  %vm448_vm4 = vcmp.ge.f32.partialorder %v446_v58, 0.0  ;;  %v449_v59 = vmul.f32 0.01, %v445_v57  ;;  %v450_v60 = vmul.f32 0.01, %v446_v58 }
 0x28d   :  { %v451_v61 = vsel %vm447_vm3, %v445_v57, %v449_v59  ;;  %v452_v62 = vsel %vm448_vm4, %v446_v58, %v450_v60 }
 0x28e   :  { %v469_v63 = vpack.c.bf16 %v452_v62, %v451_v61 }
 0x290   :  { %1956 = vmatmul.mubr.bf16.vlgmr.msra.gmra.mxu0 %v469_v63 }
 0x291   :  { %1995 = vmatprep.mubr.msk.bf16.mxu0 %vm2319_vm0, %v2318_v0  ;;  %vm1829_vm0 = vmpackc.low %vm1444_vm15, %vm1444_vm15 }
 0x2f6   :  { %v675_v1 = vpop.xlane.xlu0 %674 }
 0x2f7   :  { %v678_v2 = vsub.f32 %v668_v40, %v675_v1 }
 0x2f9   :  { %v680_v3 = vmul.f32 1.442695, %v678_v2 }
 0x2fa   :  { %v677_v4 = vpop.xlane.xlu0 %676 }
 0x2fb   :  { %2098 = vpow2.f32 %v680_v3  ;;  %v679_v5 = vsub.f32 %v671_v45, %v677_v4 }
 0x2fd   :  { %v682_v6 = vmul.f32 1.442695, %v679_v5 }
 0x2ff   :  { %2100 = vpow2.f32 %v682_v6 }
 0x308   :  { %v2467_v7 = vpop.eup %2098 }
 0x309   :  { %1094 = vrot.lane.b32.xlu1 %v2467_v7, %s2320_s6  ;;  %v841_v16 = vsel %vm840_vm5, %v2467_v7, 0.0 }
 0x30c   :  { %v2470_v8 = vpop.eup %2100 }
 0x30d   :  { %1096 = vrot.lane.b32.xlu1 %v2470_v8, %s2320_s6  ;;  %v844_v18 = vsel %vm840_vm5, %v2470_v8, 0.0 }
 0x350   :  { %v557_v9 = vpop.f32.mrf.mxu0 }
 0x351   :  { %v2475_v20 = vadd.f32 %v1802_v19, %v557_v9 }
 0x352   :  { %v1957_v10 = vpop.f32.mrf.mxu0 }
 0x354   :  { %v560_v11 = vpop.f32.mrf.mxu0 }
 0x355   :  { %v2479_v21 = vadd.f32 %v1802_v19, %v560_v11 }
 0x356   :  { %v1958_v12 = vpop.f32.mrf.mxu0 }
 0x37b   :  { %v1095_v13 = vpop.permute.xlu1 %1094 }
 0x37c   :  { %v1100_v14 = vsel %vm840_vm5, %v1095_v13, 0.0  ;;  %v2078_v13 = vld [vmem:[#allocation11 + $0x38] sm:$0xff]  }
 0x37d   :  { %1101 = vadd.xlane.f32.xlu0 %v1100_v14  ;;  %1980 = vmatpush3.bf16.msra.mxu0 %v2078_v13  ;;  %v2079_v14 = vld [vmem:[#allocation11 + $0x30] sm:$0xff]  }
 0x37e   :  { %1981 = vmatprep.subr.bf16.mxu0 %v2318_v0 }
 0x37f   :  { %v1097_v15 = vpop.permute.xlu1 %1096 }
 0x380   :  { %v1103_v17 = vsel %vm840_vm5, %v1097_v15, 0.0  ;;  %v2080_v15 = vld [vmem:[#allocation11 + $0x28] sm:$0xff]  }
 0x381   :  { %842 = vadd.xlane.f32.xlu0 %v841_v16  ;;  %1104 = vadd.xlane.f32.xlu1 %v1103_v17  ;;  %v2081_v17 = vld [vmem:[#allocation11 + $0x20] sm:$0xff]  }
 0x382   :  { %1982 = vmatpush3.bf16.msra.mxu0 %v2079_v14 }
 0x383   :  { %1983 = vmatprep.subr.bf16.mxu0 %v2318_v0 }
 0x385   :  { %845 = vadd.xlane.f32.xlu0 %v844_v18  ;;  %v2082_v18 = vld [vmem:[#allocation11 + $0x18] sm:$0xff]  }
 0x386   :  { %1984 = vmatpush3.bf16.msra.mxu0 %v2080_v15 }
 0x387   :  { %1985 = vmatprep.subr.bf16.mxu0 %v2318_v0 }
 0x38a   :  { %1986 = vmatpush3.bf16.msra.mxu0 %v2081_v17 }
 0x38b   :  { %1987 = vmatprep.subr.bf16.mxu0 %v2318_v0 }
 0x38e   :  { %1988 = vmatpush3.bf16.msra.mxu0 %v2082_v18 }
 0x38f   :  { %1989 = vmatprep.subr.bf16.mxu0 %v2318_v0 }
 0x392   :  { %692 = vrot.lane.b32.xlu1 %v2475_v20, %s2321_s7 }
 0x39b   :  { %686 = vrot.lane.b32.xlu0 %v2475_v20, %s2322_s30 }
 0x39f   :  { %688 = vrot.lane.b32.xlu0 %v2479_v21, %s2322_s30 }
 0x3a3   :  { %694 = vrot.lane.b32.xlu0 %v2479_v21, %s2321_s7 }
 0x3a7   :  { %698 = vrot.lane.b32.xlu0 %v2475_v20, %s2323_s9 }
 0x3ab   :  { %700 = vrot.lane.b32.xlu0 %v2479_v21, %s2323_s9 }
 0x406   :  { %v1102_v22 = vpop.xlane.xlu0 %1101 }
 0x407   :  { %2102 = vrcp.f32 %v1102_v22  ;;  %v2083_v22 = vld [vmem:[#allocation11 + $0x10] sm:$0xff]  }
 0x408   :  { %1990 = vmatpush3.bf16.msra.mxu0 %v2083_v22 }
 0x409   :  { %1991 = vmatprep.subr.bf16.mxu0 %v2318_v0 }
 0x40a   :  { %v1105_v23 = vpop.xlane.xlu1 %1104  ;;  %v843_v38 = vpop.xlane.xlu0 %842 }
 0x40b   :  { %2104 = vrcp.f32 %v1105_v23 }
 0x40c   :  { %2106 = vrcp.f32 %v843_v38  ;;  %1992 = vmatpush3.bf16.msra.mxu0 %v2084_v24 }
 0x40d   :  { %1993 = vmatprep.subr.bf16.mxu0 %v2318_v0 }
 0x40e   :  { %v846_v45 = vpop.xlane.xlu0 %845 }
 0x40f   :  { %2108 = vrcp.f32 %v846_v45 }
 0x412   :  { %v687_v16 = vpop.permute.xlu0 %686 }
 0x414   :  { %v2103_v28 = vpop.eup %2102 }
 0x415   :  { %v1108_v29 = vmul.f32 %v2103_v28, %v2467_v7 }
 0x416   :  { %v689_v19 = vpop.permute.xlu0 %688 }
 0x417   :  { %v1121_v30 = vrot.slane %v1108_v29, %v860_v26  ;;  %v1113_v31 = vrot.slane %v1108_v29, %v853_v27  ;;  %v1129_v36 = vrot.slane %v1108_v29, %v867_v32  ;;  %v1137_v40 = vrot.slane %v1108_v29, %v874_v37 }
 0x418   :  { %v2105_v33 = vpop.eup %2104  ;;  %v1145_v43 = vrot.slane %v1108_v29, %v881_v41  ;;  %v1153_v47 = vrot.slane %v1108_v29, %v888_v44  ;;  %v1161_v52 = vrot.slane %v1108_v29, %v895_v50  ;;  %v1169_v57 = vrot.slane %v1108_v29, %v902_v53 }
 0x419   :  { %v1109_v34 = vmul.f32 %v2105_v33, %v2470_v8  ;;  %1124 = vbcast.lane.b32.xlu1 %v1121_v30, 260  ;;  %1116 = vbcast.lane.b32.xlu0 %v1113_v31, 260  ;;  %v2107_v54 = vpop.eup %2106  ;;  %v693_v30 = vpop.permute.xlu1 %692 }
 0x41a   :  { %v849_v55 = vmul.f32 %v2107_v54, %v2467_v7  ;;  %v695_v23 = vpop.permute.xlu0 %694 }
 0x41b   :  { %v1185_v35 = vrot.slane %v1109_v34, %v860_v26  ;;  %v1193_v39 = vrot.slane %v1109_v34, %v867_v32  ;;  %v1201_v42 = vrot.slane %v1109_v34, %v874_v37  ;;  %v1209_v46 = vrot.slane %v1109_v34, %v881_v41 }
 0x41c   :  { %v1217_v48 = vrot.slane %v1109_v34, %v888_v44  ;;  %v1177_v49 = vrot.slane %v1109_v34, %v853_v27  ;;  %v1225_v51 = vrot.slane %v1109_v34, %v895_v50  ;;  %v1233_v56 = vrot.slane %v1109_v34, %v902_v53  ;;  %v2109_v58 = vpop.eup %2108 }
 0x41d   :  { %1188 = vbcast.lane.b32.xlu1 %v1185_v35, 260  ;;  %1132 = vbcast.lane.b32.xlu0 %v1129_v36, 260  ;;  %v850_v59 = vmul.f32 %v2109_v58, %v2470_v8  ;;  %v861_v60 = vrot.slane %v849_v55, %v860_v26  ;;  %v854_v61 = vrot.slane %v849_v55, %v853_v27 }
 0x41e   :  { %v868_v2 = vrot.slane %v849_v55, %v867_v32  ;;  %v875_v4 = vrot.slane %v849_v55, %v874_v37  ;;  %v882_v6 = vrot.slane %v849_v55, %v881_v41  ;;  %v889_v8 = vrot.slane %v849_v55, %v888_v44  ;;  %v699_v28 = vpop.permute.xlu0 %698 }
 0x41f   :  { %v917_v62 = vrot.slane %v850_v59, %v860_v26  ;;  %v910_v63 = vrot.slane %v850_v59, %v853_v27  ;;  %v924_v1 = vrot.slane %v850_v59, %v867_v32  ;;  %v931_v3 = vrot.slane %v850_v59, %v874_v37 }
 0x420   :  { %v938_v5 = vrot.slane %v850_v59, %v881_v41  ;;  %v945_v7 = vrot.slane %v850_v59, %v888_v44  ;;  %v952_v9 = vrot.slane %v850_v59, %v895_v50  ;;  %v896_v10 = vrot.slane %v849_v55, %v895_v50 }
 0x421   :  { %1196 = vbcast.lane.b32.xlu1 %v1193_v39, 260  ;;  %1140 = vbcast.lane.b32.xlu0 %v1137_v40, 260  ;;  %v959_v11 = vrot.slane %v850_v59, %v902_v53  ;;  %v903_v12 = vrot.slane %v849_v55, %v902_v53  ;;  %v2324_v26 = vmov 1983009808   ;;  %v720_v31 = vcombine.low %v687_v16, %v699_v28 }
 0x422   :  { %v707_v27 = vunpack.c.l.s4 %v2324_v26  ;;  %v2325_v32 = vmov 1934713408   ;;  %v701_v34 = vpop.permute.xlu0 %700  ;;  %v704_v36 = vcombine.low %v2475_v20, %v693_v30  ;;  %v772_v41 = vcombine.low %v2479_v21, %v695_v23 }
 0x423   :  { %v739_v33 = vunpack.c.l.s4 %v2325_v32  ;;  %v788_v38 = vcombine.low %v689_v19, %v701_v34  ;;  %v773_v53 = vcombine.high %v2479_v21, %v695_v23 }
 0x424   :  { %v708_v29 = vunpack.c.0.s8 %v707_v27 }
 0x425   :  { %1204 = vbcast.lane.b32.xlu1 %v1201_v42, 260  ;;  %1148 = vbcast.lane.b32.xlu0 %v1145_v43, 260  ;;  %v740_v39 = vunpack.c.0.s8 %v739_v33  ;;  %v721_v42 = vcombine.high %v687_v16, %v699_v28 }
 0x426   :  { %v711_v35 = vsub.s32 %v708_v29, %v2485_v25 }
 0x427   :  { %v743_v45 = vsub.s32 %v740_v39, %v2485_v25 }
 0x428   :  { %v728_v37 = vrot.slane %v720_v31, %v711_v35  ;;  %v712_v40 = vrot.slane %v704_v36, %v711_v35  ;;  %v796_v44 = vrot.slane %v788_v38, %v711_v35  ;;  %v787_v59 = vrot.slane %v773_v53, %v711_v35 }
 0x429   :  { %1212 = vbcast.lane.b32.xlu1 %v1209_v46, 260  ;;  %1156 = vbcast.lane.b32.xlu0 %v1153_v47, 260  ;;  %v705_v46 = vcombine.high %v2475_v20, %v693_v30  ;;  %v780_v47 = vrot.slane %v772_v41, %v711_v35 }
 0x42a   :  { %v736_v43 = vcombine.low %v712_v40, %v728_v37  ;;  %v737_v54 = vcombine.high %v712_v40, %v728_v37 }
 0x42b   :  { %v804_v50 = vcombine.low %v780_v47, %v796_v44 }
 0x42c   :  { %v2522_v21 = vrot.slane %v737_v54, %v743_v45 }
 0x42d   :  { %1220 = vbcast.lane.b32.xlu1 %v1217_v48, 260  ;;  %1180 = vbcast.lane.b32.xlu0 %v1177_v49, 260  ;;  %v735_v48 = vrot.slane %v721_v42, %v711_v35  ;;  %v789_v49 = vcombine.high %v689_v19, %v701_v34  ;;  %v2518_v58 = vrot.slane %v804_v50, %v743_v45 }
 0x42e   :  { %v2538_v16 = vcombine.high %v2522_v21, %v2318_v0 }
 0x431   :  { %1228 = vbcast.lane.b32.xlu1 %v1225_v51, 260  ;;  %1164 = vbcast.lane.b32.xlu0 %v1161_v52, 260  ;;  %v2511_v51 = vrot.slane %v736_v43, %v743_v45  ;;  %v719_v52 = vrot.slane %v705_v46, %v711_v35 }
 0x433   :  { %v752_v55 = vcombine.low %v719_v52, %v735_v48 }
 0x435   :  { %1236 = vbcast.lane.b32.xlu1 %v1233_v56, 260  ;;  %1172 = vbcast.lane.b32.xlu0 %v1169_v57, 260  ;;  %v803_v56 = vrot.slane %v789_v49, %v711_v35  ;;  %v2516_v57 = vcombine.high %v2511_v51, %v2318_v0 }
 0x439   :  { %863 = vbcast.lane.b32.xlu1 %v861_v60, 256  ;;  %856 = vbcast.lane.b32.xlu0 %v854_v61, 256  ;;  %v753_v60 = vcombine.high %v719_v52, %v735_v48 }
 0x43b   :  { %v2534_v13 = vrot.slane %v753_v60, %v743_v45 }
 0x43d   :  { %919 = vbcast.lane.b32.xlu1 %v917_v62, 256  ;;  %912 = vbcast.lane.b32.xlu0 %v910_v63, 256  ;;  %v805_v63 = vcombine.high %v780_v47, %v796_v44  ;;  %v2556_v34 = vcombine.high %v2534_v13, %v2318_v0 }
 0x43f   :  { %v2546_v22 = vrot.slane %v805_v63, %v743_v45 }
 0x441   :  { %926 = vbcast.lane.b32.xlu1 %v924_v1, 256  ;;  %870 = vbcast.lane.b32.xlu0 %v868_v2, 256  ;;  %v2524_v1 = vrot.slane %v752_v55, %v743_v45  ;;  %v820_v2 = vcombine.low %v787_v59, %v803_v56  ;;  %v2562_v41 = vcombine.high %v2546_v22, %v2318_v0 }
 0x443   :  { %v2542_v17 = vcombine.high %v2524_v1, %v2318_v0  ;;  %v2548_v23 = vrot.slane %v820_v2, %v743_v45 }
 0x445   :  { %933 = vbcast.lane.b32.xlu1 %v931_v3, 256  ;;  %877 = vbcast.lane.b32.xlu0 %v875_v4, 256  ;;  %v2566_v42 = vcombine.high %v2548_v23, %v2318_v0 }
 0x449   :  { %940 = vbcast.lane.b32.xlu1 %v938_v5, 256  ;;  %884 = vbcast.lane.b32.xlu0 %v882_v6, 256  ;;  %v2530_v5 = vcombine.high %v2518_v58, %v2318_v0 }
 0x44d   :  { %947 = vbcast.lane.b32.xlu1 %v945_v7, 256  ;;  %891 = vbcast.lane.b32.xlu0 %v889_v8, 256 }
 0x451   :  { %954 = vbcast.lane.b32.xlu1 %v952_v9, 256  ;;  %898 = vbcast.lane.b32.xlu0 %v896_v10, 256  ;;  %v821_v10 = vcombine.high %v787_v59, %v803_v56 }
 0x453   :  { %v2552_v33 = vrot.slane %v821_v10, %v743_v45 }
 0x455   :  { %961 = vbcast.lane.b32.xlu1 %v959_v11, 256  ;;  %905 = vbcast.lane.b32.xlu0 %v903_v12, 256 }
 0x48b   :  { %v1125_v20 = vpop.permute.xlu1 %1124  ;;  %v1117_v25 = vpop.permute.xlu0 %1116 }
 0x48c   :  { %v1239_v61 = vmul.f32 %v1125_v20, %v2516_v57  ;;  %v1238_v62 = vmul.f32 %v1117_v25, %v2511_v51 }
 0x48e   :  { %v1261_v3 = vsel %vm979_vm6, %v1239_v61, 0.0  ;;  %v1254_v4 = vsel %vm979_vm6, %v1238_v62, 0.0 }
 0x48f   :  { %v1262_v6 = vrot.slane %v1261_v3, 4  ;;  %v1255_v7 = vrot.slane %v1254_v4, 4  ;;  %v1189_v8 = vpop.permute.xlu1 %1188  ;;  %v1133_v9 = vpop.permute.xlu0 %1132 }
 0x490   :  { %v1247_v11 = vmul.f32 %v1189_v8, %v2530_v5  ;;  %v1240_v12 = vmul.f32 %v1133_v9, %v2522_v21 }
 0x491   :  { %v1263_v14 = vadd.f32 %v1262_v6, %v1261_v3  ;;  %v1256_v15 = vadd.f32 %v1255_v7, %v1254_v4  ;;  %v2574_v6 = vcombine.high %v2552_v33, %v2318_v0 }
 0x492   :  { %v1317_v18 = vsel %vm979_vm6, %v1247_v11, 0.0  ;;  %v1268_v19 = vsel %vm979_vm6, %v1240_v12, 0.0 }
 0x493   :  { %v1264_v24 = vrot.slane %v1263_v14, 2  ;;  %v1257_v26 = vrot.slane %v1256_v15, 2  ;;  %v1318_v27 = vrot.slane %v1317_v18, 4  ;;  %v1269_v28 = vrot.slane %v1268_v19, 4  ;;  %v1197_v29 = vpop.permute.xlu1 %1196  ;;  %v1141_v30 = vpop.permute.xlu0 %1140 }
 0x494   :  { %v1248_v31 = vmul.f32 %v1197_v29, %v2546_v22  ;;  %v1241_v32 = vmul.f32 %v1141_v30, %v2538_v16 }
 0x495   :  { %v1265_v35 = vadd.f32 %v1264_v24, %v1263_v14  ;;  %v1258_v36 = vadd.f32 %v1257_v26, %v1256_v15  ;;  %v1319_v37 = vadd.f32 %v1318_v27, %v1317_v18  ;;  %v1270_v38 = vadd.f32 %v1269_v28, %v1268_v19 }
 0x496   :  { %v1324_v39 = vsel %vm979_vm6, %v1248_v31, 0.0  ;;  %v1275_v40 = vsel %vm979_vm6, %v1241_v32, 0.0 }
 0x497   :  { %v1266_v43 = vrot.slane %v1265_v35, 1  ;;  %v1259_v44 = vrot.slane %v1258_v36, 1  ;;  %v1320_v45 = vrot.slane %v1319_v37, 2  ;;  %v1271_v46 = vrot.slane %v1270_v38, 2  ;;  %v1205_v47 = vpop.permute.xlu1 %1204  ;;  %v1149_v48 = vpop.permute.xlu0 %1148 }
 0x498   :  { %v1325_v49 = vrot.slane %v1324_v39, 4  ;;  %v1276_v50 = vrot.slane %v1275_v40, 4  ;;  %v1249_v52 = vmul.f32 %v1205_v47, %v2562_v41  ;;  %v1242_v53 = vmul.f32 %v1149_v48, %v2524_v1 }
 0x499   :  { %v1267_v54 = vadd.f32 %v1266_v43, %v1265_v35  ;;  %v1260_v55 = vadd.f32 %v1259_v44, %v1258_v36  ;;  %v1321_v56 = vadd.f32 %v1320_v45, %v1319_v37  ;;  %v1272_v20 = vadd.f32 %v1271_v46, %v1270_v38 }
 0x49a   :  { %v1326_v25 = vadd.f32 %v1325_v49, %v1324_v39  ;;  %v1277_v59 = vadd.f32 %v1276_v50, %v1275_v40  ;;  %v1331_v60 = vsel %vm979_vm6, %v1249_v52, 0.0  ;;  %v1282_v61 = vsel %vm979_vm6, %v1242_v53, 0.0 }
 0x49b   :  { %v1322_v62 = vrot.slane %v1321_v56, 1  ;;  %v1273_v63 = vrot.slane %v1272_v20, 1  ;;  %v1332_v2 = vrot.slane %v1331_v60, 4  ;;  %v1213_v3 = vpop.permute.xlu1 %1212  ;;  %v1157_v4 = vpop.permute.xlu0 %1156  ;;  %v1283_v9 = vrot.slane %v1282_v61, 4 }
 0x49c   :  { %v1327_v7 = vrot.slane %v1326_v25, 2  ;;  %v1278_v8 = vrot.slane %v1277_v59, 2  ;;  %v1250_v10 = vmul.f32 %v1213_v3, %v2548_v23  ;;  %v1421_v11 = vsel %vm1382_vm7, %v1267_v54, %v1260_v55 }
 0x49d   :  { %v1274_v12 = vadd.f32 %v1273_v63, %v1272_v20  ;;  %v1333_v14 = vadd.f32 %v1332_v2, %v1331_v60  ;;  %v1243_v15 = vmul.f32 %v1157_v4, %v2542_v17  ;;  %v1284_v24 = vadd.f32 %v1283_v9, %v1282_v61 }
 0x49e   :  { %v1328_v18 = vadd.f32 %v1327_v7, %v1326_v25  ;;  %v1279_v19 = vadd.f32 %v1278_v8, %v1277_v59  ;;  %v1338_v26 = vsel %vm979_vm6, %v1250_v10, 0.0  ;;  %v2580_v27 = vadd.f32 %v1322_v62, %v1321_v56 }
 0x49f   :  { %v1334_v28 = vrot.slane %v1333_v14, 2  ;;  %v1339_v29 = vrot.slane %v1338_v26, 4  ;;  %v1289_v30 = vsel %vm979_vm6, %v1243_v15, 0.0  ;;  %v1221_v31 = vpop.permute.xlu1 %1220  ;;  %v1181_v32 = vpop.permute.xlu0 %1180  ;;  %v1285_v37 = vrot.slane %v1284_v24, 2 }
 0x4a0   :  { %v1329_v35 = vrot.slane %v1328_v18, 1  ;;  %v1280_v36 = vrot.slane %v1279_v19, 1  ;;  %v1290_v38 = vrot.slane %v1289_v30, 4  ;;  %v1251_v43 = vmul.f32 %v1221_v31, %v2566_v42 }
 0x4a1   :  { %v1335_v39 = vadd.f32 %v1334_v28, %v1333_v14  ;;  %v1340_v40 = vadd.f32 %v1339_v29, %v1338_v26  ;;  %v1246_v44 = vmul.f32 %v1181_v32, %v2518_v58  ;;  %v1422_v45 = vsel %vm1384_vm8, %v1274_v12, %v1421_v11 }
 0x4a2   :  { %v1281_v46 = vadd.f32 %v1280_v36, %v1279_v19  ;;  %v1286_v47 = vadd.f32 %v1285_v37, %v1284_v24  ;;  %v1291_v48 = vadd.f32 %v1290_v38, %v1289_v30  ;;  %v1345_v52 = vsel %vm979_vm6, %v1251_v43, 0.0 }
 0x4a3   :  { %v1336_v49 = vrot.slane %v1335_v39, 1  ;;  %v1341_v50 = vrot.slane %v1340_v40, 2  ;;  %v1310_v53 = vsel %vm979_vm6, %v1246_v44, 0.0  ;;  %v1229_v54 = vpop.permute.xlu1 %1228  ;;  %v1165_v55 = vpop.permute.xlu0 %1164  ;;  %v2588_v56 = vadd.f32 %v1329_v35, %v1328_v18 }
 0x4a4   :  { %v1287_v20 = vrot.slane %v1286_v47, 1  ;;  %v1292_v25 = vrot.slane %v1291_v48, 2  ;;  %v1346_v59 = vrot.slane %v1345_v52, 4  ;;  %v1423_v60 = vsel %vm1386_vm9, %v1281_v46, %v1422_v45 }
 0x4a5   :  { %v1342_v61 = vadd.f32 %v1341_v50, %v1340_v40  ;;  %v1311_v62 = vrot.slane %v1310_v53, 4  ;;  %v1252_v63 = vmul.f32 %v1229_v54, %v2552_v33  ;;  %v2592_v2 = vadd.f32 %v1336_v49, %v1335_v39 }
 0x4a6   :  { %v1293_v3 = vadd.f32 %v1292_v25, %v1291_v48  ;;  %v1347_v4 = vadd.f32 %v1346_v59, %v1345_v52  ;;  %v1244_v7 = vmul.f32 %v1165_v55, %v2534_v13  ;;  %v1288_v8 = vadd.f32 %v1287_v20, %v1286_v47 }
 0x4a7   :  { %v1343_v9 = vrot.slane %v1342_v61, 1  ;;  %v1312_v10 = vadd.f32 %v1311_v62, %v1310_v53  ;;  %v1352_v11 = vsel %vm979_vm6, %v1252_v63, 0.0  ;;  %v1237_v12 = vpop.permute.xlu1 %1236  ;;  %v1173_v14 = vpop.permute.xlu0 %1172 }
 0x4a8   :  { %v1294_v15 = vrot.slane %v1293_v3, 1  ;;  %v1348_v18 = vrot.slane %v1347_v4, 2  ;;  %v1353_v19 = vrot.slane %v1352_v11, 4  ;;  %v1296_v24 = vsel %vm979_vm6, %v1244_v7, 0.0 }
 0x4a9   :  { %v2597_v26 = vadd.f32 %v1343_v9, %v1342_v61  ;;  %v1313_v28 = vrot.slane %v1312_v10, 2  ;;  %v1297_v29 = vrot.slane %v1296_v24, 4  ;;  %v1253_v30 = vmul.f32 %v1237_v12, %v2574_v6 }
 0x4aa   :  { %v2600_v31 = vadd.f32 %v1294_v15, %v1293_v3  ;;  %v1349_v32 = vadd.f32 %v1348_v18, %v1347_v4  ;;  %v1354_v35 = vadd.f32 %v1353_v19, %v1352_v11  ;;  %v1245_v36 = vmul.f32 %v1173_v14, %v2556_v34 }
 0x4ab   :  { %v1314_v37 = vadd.f32 %v1313_v28, %v1312_v10  ;;  %v1298_v38 = vadd.f32 %v1297_v29, %v1296_v24  ;;  %v1359_v39 = vsel %vm979_vm6, %v1253_v30, 0.0  ;;  %v864_v40 = vpop.permute.xlu1 %863  ;;  %v857_v43 = vpop.permute.xlu0 %856  ;;  %v2605_v44 = vsel %vm1388_vm10, %v1288_v8, %v1423_v60 }
 0x4ac   :  { %v1350_v45 = vrot.slane %v1349_v32, 1  ;;  %v1355_v46 = vrot.slane %v1354_v35, 2  ;;  %v1360_v47 = vrot.slane %v1359_v39, 4  ;;  %v1303_v48 = vsel %vm979_vm6, %v1245_v36, 0.0 }
 0x4ad   :  { %v1315_v49 = vrot.slane %v1314_v37, 1  ;;  %v1299_v50 = vrot.slane %v1298_v38, 2  ;;  %v1304_v52 = vrot.slane %v1303_v48, 4  ;;  %v964_v53 = vmul.f32 %v864_v40, %v2516_v57 }
 0x4ae   :  { %v2609_v54 = vadd.f32 %v1350_v45, %v1349_v32  ;;  %v1356_v55 = vadd.f32 %v1355_v46, %v1354_v35  ;;  %v1361_v20 = vadd.f32 %v1360_v47, %v1359_v39  ;;  %v963_v25 = vmul.f32 %v857_v43, %v2511_v51 }
 0x4af   :  { %v1316_v59 = vadd.f32 %v1315_v49, %v1314_v37  ;;  %v1300_v61 = vadd.f32 %v1299_v50, %v1298_v38  ;;  %v1305_v60 = vadd.f32 %v1304_v52, %v1303_v48  ;;  %v987_v62 = vsel %vm979_vm6, %v964_v53, 0.0  ;;  %v920_v63 = vpop.permute.xlu1 %919  ;;  %v913_v3 = vpop.permute.xlu0 %912 }
 0x4b0   :  { %v1357_v4 = vrot.slane %v1356_v55, 1  ;;  %v1362_v7 = vrot.slane %v1361_v20, 2  ;;  %v988_v8 = vrot.slane %v987_v62, 4  ;;  %v980_v9 = vsel %vm979_vm6, %v963_v25, 0.0 }
 0x4b1   :  { %v1428_v57 = vsel %vm1382_vm7, %v2580_v27, %v1316_v59  ;;  %v1301_v10 = vrot.slane %v1300_v61, 1  ;;  %v1306_v11 = vrot.slane %v1305_v60, 2  ;;  %v981_v12 = vrot.slane %v980_v9, 4 }
 0x4b2   :  { %v2618_v51 = vsel %vm1384_vm8, %v2588_v56, %v1428_v57  ;;  %v2620_v14 = vadd.f32 %v1357_v4, %v1356_v55  ;;  %v1363_v15 = vadd.f32 %v1362_v7, %v1361_v20  ;;  %v989_v18 = vadd.f32 %v988_v8, %v987_v62 }
 0x4b3   :  { %v1302_v19 = vadd.f32 %v1301_v10, %v1300_v61  ;;  %v1307_v24 = vadd.f32 %v1306_v11, %v1305_v60  ;;  %v982_v28 = vadd.f32 %v981_v12, %v980_v9  ;;  %v972_v29 = vmul.f32 %v920_v63, %v2530_v5  ;;  %v927_v30 = vpop.permute.xlu1 %926  ;;  %v871_v32 = vpop.permute.xlu0 %870 }
 0x4b4   :  { %v1364_v27 = vrot.slane %v1363_v15, 1  ;;  %v990_v35 = vrot.slane %v989_v18, 2  ;;  %v971_v36 = vmul.f32 %v913_v3, %v2518_v58  ;;  %v973_v37 = vmul.f32 %v927_v30, %v2546_v22 }
 0x4b5   :  { %v1308_v56 = vrot.slane %v1307_v24, 1  ;;  %v983_v38 = vrot.slane %v982_v28, 2  ;;  %v1043_v39 = vsel %vm979_vm6, %v972_v29, 0.0  ;;  %v965_v40 = vmul.f32 %v871_v32, %v2522_v21 }
 0x4b6   :  { %v2627_v43 = vadd.f32 %v1364_v27, %v1363_v15  ;;  %v991_v5 = vadd.f32 %v990_v35, %v989_v18  ;;  %v1044_v45 = vrot.slane %v1043_v39, 4  ;;  %v1036_v46 = vsel %vm979_vm6, %v971_v36, 0.0  ;;  %v2085_v35 = vld [vmem:[#allocation11] sm:$0xff]  }
 0x4b7   :  { %v1309_v47 = vadd.f32 %v1308_v56, %v1307_v24  ;;  %v984_v48 = vadd.f32 %v983_v38, %v982_v28  ;;  %v1037_v49 = vrot.slane %v1036_v46, 4  ;;  %v1050_v58 = vsel %vm979_vm6, %v973_v37, 0.0  ;;  %v934_v22 = vpop.permute.xlu1 %933  ;;  %v878_v50 = vpop.permute.xlu0 %877  ;;  %1994 = vmatpush3.bf16.msra.mxu0 %v2085_v35 }
 0x4b8   :  { %v992_v52 = vrot.slane %v991_v5, 1  ;;  %v1045_v53 = vadd.f32 %v1044_v45, %v1043_v39  ;;  %v1051_v55 = vrot.slane %v1050_v58, 4  ;;  %v994_v20 = vsel %vm979_vm6, %v965_v40, 0.0 }
 0x4b9   :  { %v985_v21 = vrot.slane %v984_v48, 1  ;;  %v1038_v25 = vadd.f32 %v1037_v49, %v1036_v46  ;;  %v995_v59 = vrot.slane %v994_v20, 4  ;;  %v974_v61 = vmul.f32 %v934_v22, %v2562_v41 }
 0x4ba   :  { %v993_v60 = vadd.f32 %v992_v52, %v991_v5  ;;  %v1046_v62 = vrot.slane %v1045_v53, 2  ;;  %v1052_v63 = vadd.f32 %v1051_v55, %v1050_v58  ;;  %v966_v3 = vmul.f32 %v878_v50, %v2538_v16 }
 0x4bb   :  { %v986_v4 = vadd.f32 %v985_v21, %v984_v48  ;;  %v1039_v7 = vrot.slane %v1038_v25, 2  ;;  %v996_v8 = vadd.f32 %v995_v59, %v994_v20  ;;  %v1057_v9 = vsel %vm979_vm6, %v974_v61, 0.0  ;;  %v941_v57 = vpop.permute.xlu1 %940  ;;  %v885_v10 = vpop.permute.xlu0 %884 }
 0x4bc   :  { %v1047_v11 = vadd.f32 %v1046_v62, %v1045_v53  ;;  %v1053_v12 = vrot.slane %v1052_v63, 2  ;;  %v1058_v15 = vrot.slane %v1057_v9, 4  ;;  %v1001_v18 = vsel %vm979_vm6, %v966_v3, 0.0 }
 0x4bd   :  { %v1383_v24 = vsel %vm1382_vm7, %v993_v60, %v986_v4  ;;  %v1040_v41 = vadd.f32 %v1039_v7, %v1038_v25  ;;  %v997_v28 = vrot.slane %v996_v8, 2  ;;  %v1002_v29 = vrot.slane %v1001_v18, 4 }
 0x4be   :  { %v1048_v30 = vrot.slane %v1047_v11, 1  ;;  %v1054_v32 = vadd.f32 %v1053_v12, %v1052_v63  ;;  %v1059_v16 = vadd.f32 %v1058_v15, %v1057_v9  ;;  %v1425_v27 = vsel %vm1390_vm11, %v2600_v31, %v2605_v44 }
 0x4bf   :  { %v1041_v36 = vrot.slane %v1040_v41, 1  ;;  %v998_v37 = vadd.f32 %v997_v28, %v996_v8  ;;  %v1003_v56 = vadd.f32 %v1002_v29, %v1001_v18  ;;  %v1426_v38 = vsel %vm1392_vm12, %v1302_v19, %v1425_v27  ;;  %v948_v39 = vpop.permute.xlu1 %947  ;;  %v892_v40 = vpop.permute.xlu0 %891 }
 0x4c0   :  { %v1049_v5 = vadd.f32 %v1048_v30, %v1047_v11  ;;  %v1055_v45 = vrot.slane %v1054_v32, 1  ;;  %v1060_v46 = vrot.slane %v1059_v16, 2  ;;  %v1427_v48 = vsel %vm1394_vm13, %v1309_v47, %v1426_v38 }
 0x4c1   :  { %v1042_v49 = vadd.f32 %v1041_v36, %v1040_v41  ;;  %v999_v58 = vrot.slane %v998_v37, 1  ;;  %v1004_v22 = vrot.slane %v1003_v56, 2  ;;  %v1430_v31 = vsel %vm1386_vm9, %v2592_v2, %v2618_v51 }
 0x4c2   :  { %v1056_v44 = vadd.f32 %v1055_v45, %v1054_v32  ;;  %v1061_v50 = vadd.f32 %v1060_v46, %v1059_v16  ;;  %v1431_v19 = vsel %vm1388_vm10, %v2597_v26, %v1430_v31  ;;  %v975_v52 = vmul.f32 %v941_v57, %v2548_v23 }
 0x4c3   :  { %v1396_v53 = vsel %vm1382_vm7, %v1049_v5, %v1042_v49  ;;  %v1000_v55 = vadd.f32 %v999_v58, %v998_v37  ;;  %v1005_v20 = vadd.f32 %v1004_v22, %v1003_v56  ;;  %v1432_v47 = vsel %vm1390_vm11, %v2609_v54, %v1431_v19  ;;  %v955_v21 = vpop.permute.xlu1 %954  ;;  %v899_v25 = vpop.permute.xlu0 %898 }
 0x4c4   :  { %v1397_v59 = vsel %vm1384_vm8, %v1056_v44, %v1396_v53  ;;  %v1062_v61 = vrot.slane %v1061_v50, 1  ;;  %v1433_v2 = vsel %vm1392_vm12, %v2620_v14, %v1432_v47  ;;  %v1064_v51 = vsel %vm979_vm6, %v975_v52, 0.0 }
 0x4c5   :  { %v1385_v26 = vsel %vm1384_vm8, %v1000_v55, %v1383_v24  ;;  %v1006_v23 = vrot.slane %v1005_v20, 1  ;;  %v1434_v60 = vsel %vm1394_vm13, %v2627_v43, %v1433_v2  ;;  %v1065_v62 = vrot.slane %v1064_v51, 4 }
 0x4c6   :  { %v1063_v63 = vadd.f32 %v1062_v61, %v1061_v50  ;;  %v2041_v3 = vpack.i.bf16 %v1434_v60, %v1427_v48  ;;  %v967_v54 = vmul.f32 %v885_v10, %v2524_v1  ;;  %v976_v4 = vmul.f32 %v948_v39, %v2566_v42 }
 0x4c7   :  { %v1007_v7 = vadd.f32 %v1006_v23, %v1005_v20  ;;  %v1066_v8 = vadd.f32 %v1065_v62, %v1064_v51  ;;  %v968_v9 = vmul.f32 %v892_v40, %v2542_v17  ;;  %v977_v14 = vmul.f32 %v955_v21, %v2552_v33  ;;  %v962_v57 = vpop.permute.xlu1 %961  ;;  %v906_v24 = vpop.permute.xlu0 %905 }
 0x4c8   :  { %v1398_v11 = vsel %vm1386_vm9, %v1063_v63, %v1397_v59  ;;  %2042 = vrot.lane.b32.xlu0 %v2041_v3, %s2326_s22  ;;  %v1008_v43 = vsel %vm979_vm6, %v967_v54, 0.0  ;;  %v1071_v12 = vsel %vm979_vm6, %v976_v4, 0.0  ;;  %v969_v15 = vmul.f32 %v899_v25, %v2534_v13 }
 0x4c9   :  { %v1387_v1 = vsel %vm1386_vm9, %v1007_v7, %v1385_v26  ;;  %v1067_v42 = vrot.slane %v1066_v8, 2  ;;  %v1009_v10 = vrot.slane %v1008_v43, 4  ;;  %v1072_v18 = vrot.slane %v1071_v12, 4 }
 0x4ca   :  { %v1015_v17 = vsel %vm979_vm6, %v968_v9, 0.0  ;;  %v1078_v33 = vsel %vm979_vm6, %v977_v14, 0.0  ;;  %v1022_v41 = vsel %vm979_vm6, %v969_v15, 0.0  ;;  %v978_v28 = vmul.f32 %v962_v57, %v2574_v6 }
 0x4cb   :  { %v1068_v29 = vadd.f32 %v1067_v42, %v1066_v8  ;;  %v1010_v30 = vadd.f32 %v1009_v10, %v1008_v43  ;;  %v1073_v32 = vadd.f32 %v1072_v18, %v1071_v12  ;;  %v1016_v16 = vrot.slane %v1015_v17, 4 }
 0x4cc   :  { %v1079_v27 = vrot.slane %v1078_v33, 4  ;;  %v1023_v13 = vrot.slane %v1022_v41, 4  ;;  %v1085_v35 = vsel %vm979_vm6, %v978_v28, 0.0  ;;  %v970_v36 = vmul.f32 %v906_v24, %v2556_v34  ;;  %v2088_v28 = vld [vmem:[#allocation13 + $0x28] sm:$0xff]  }
 0x4cd   :  { %v1069_v37 = vrot.slane %v1068_v29, 1  ;;  %v1011_v56 = vrot.slane %v1010_v30, 2  ;;  %v1074_v38 = vrot.slane %v1073_v32, 2  ;;  %v1017_v39 = vadd.f32 %v1016_v16, %v1015_v17  ;;  %v2092_v16 = vld [vmem:[#allocation13 + $0x8] sm:$0xff]  }
 0x4ce   :  { %v1080_v40 = vadd.f32 %v1079_v27, %v1078_v33  ;;  %v1024_v5 = vadd.f32 %v1023_v13, %v1022_v41  ;;  %v1086_v45 = vrot.slane %v1085_v35, 4  ;;  %v1029_v46 = vsel %vm979_vm6, %v970_v36, 0.0  ;;  %v2086_v33 = vld [vmem:[#allocation13 + $0x38] sm:$0xff]   ;;  %v2087_v41 = vld [vmem:[#allocation13 + $0x30] sm:$0xff]   ;;  %v2093_v27 = vld [vmem:[#allocation13] sm:$0xff]  }
 0x4cf   :  { %v1070_v6 = vadd.f32 %v1069_v37, %v1068_v29  ;;  %v1012_v48 = vadd.f32 %v1011_v56, %v1010_v30  ;;  %v1075_v49 = vadd.f32 %v1074_v38, %v1073_v32  ;;  %v1018_v58 = vrot.slane %v1017_v39, 2  ;;  %2000 = vmatpush3.bf16.msra.mxu1 %v2086_v33  ;;  %v2089_v29 = vld [vmem:[#allocation13 + $0x20] sm:$0xff]   ;;  %v2090_v30 = vld [vmem:[#allocation13 + $0x18] sm:$0xff]   ;;  %v2091_v32 = vld [vmem:[#allocation13 + $0x10] sm:$0xff]  }
 0x4d0   :  { %v1081_v22 = vrot.slane %v1080_v40, 2  ;;  %v1025_v31 = vrot.slane %v1024_v5, 2  ;;  %v1087_v44 = vadd.f32 %v1086_v45, %v1085_v35  ;;  %v1030_v50 = vrot.slane %v1029_v46, 4  ;;  %2001 = vmatprep.subr.bf16.mxu1 %v2318_v0  ;;  %v1820_v35 = vld [vmem:[#allocation14 + $0x8] ss:$0 sm:$0xff] }
 0x4d1   :  { %v1399_v19 = vsel %vm1388_vm10, %v1070_v6, %v1398_v11  ;;  %v1013_v34 = vrot.slane %v1012_v48, 1  ;;  %v1076_v52 = vrot.slane %v1075_v49, 1  ;;  %v1019_v53 = vadd.f32 %v1018_v58, %v1017_v39 }
 0x4d2   :  { %v1082_v55 = vadd.f32 %v1081_v22, %v1080_v40  ;;  %v1026_v20 = vadd.f32 %v1025_v31, %v1024_v5  ;;  %v1088_v47 = vrot.slane %v1087_v44, 2  ;;  %v1031_v21 = vadd.f32 %v1030_v50, %v1029_v46 }
 0x4d3   :  { %v1014_v25 = vadd.f32 %v1013_v34, %v1012_v48  ;;  %v1077_v59 = vadd.f32 %v1076_v52, %v1075_v49  ;;  %v1020_v61 = vrot.slane %v1019_v53, 1  ;;  %2002 = vmatpush3.bf16.msra.mxu1 %v2087_v41 }
 0x4d4   :  { %v1083_v2 = vrot.slane %v1082_v55, 1  ;;  %v1027_v51 = vrot.slane %v1026_v20, 1  ;;  %v1089_v26 = vadd.f32 %v1088_v47, %v1087_v44  ;;  %v1032_v23 = vrot.slane %v1031_v21, 2  ;;  %2003 = vmatprep.subr.bf16.mxu1 %v2318_v0 }
 0x4d5   :  { %v1389_v60 = vsel %vm1388_vm10, %v1014_v25, %v1387_v1  ;;  %v1021_v62 = vadd.f32 %v1020_v61, %v1019_v53  ;;  %v1400_v63 = vsel %vm1390_vm11, %v1077_v59, %v1399_v19  ;;  %v1832_v59 = vld [vmem:[#allocation14 + $0x9] ss:$0 sm:$0xff] }
 0x4d6   :  { %v1084_v3 = vadd.f32 %v1083_v2, %v1082_v55  ;;  %v1028_v54 = vadd.f32 %v1027_v51, %v1026_v20  ;;  %v1090_v4 = vrot.slane %v1089_v26, 1  ;;  %v1033_v7 = vadd.f32 %v1032_v23, %v1031_v21  ;;  %v1833_v51 = vld [vmem:[#allocation14 + $0xa] ss:$0 sm:$0xff] }
 0x4d7   :  { %v1391_v8 = vsel %vm1390_vm11, %v1021_v62, %v1389_v60  ;;  %2004 = vmatpush3.bf16.msra.mxu1 %v2088_v28 }
 0x4d8   :  { %v1091_v9 = vadd.f32 %v1090_v4, %v1089_v26  ;;  %v1034_v14 = vrot.slane %v1033_v7, 1  ;;  %v1393_v57 = vsel %vm1392_vm12, %v1028_v54, %v1391_v8  ;;  %v1401_v11 = vsel %vm1392_vm12, %v1084_v3, %v1400_v63  ;;  %2005 = vmatprep.subr.bf16.mxu1 %v2318_v0 }
 0x4da   :  { %v1035_v43 = vadd.f32 %v1034_v14, %v1033_v7  ;;  %v1402_v12 = vsel %vm1394_vm13, %v1091_v9, %v1401_v11  ;;  %v1834_v9 = vld [vmem:[#allocation14 + $0xb] ss:$0 sm:$0xff] }
 0x4db   :  { %2006 = vmatpush3.bf16.msra.mxu1 %v2089_v29 }
 0x4dc   :  { %v1395_v15 = vsel %vm1394_vm13, %v1035_v43, %v1393_v57  ;;  %2007 = vmatprep.subr.bf16.mxu1 %v2318_v0 }
 0x4df   :  { %2008 = vmatpush3.bf16.msra.mxu1 %v2090_v30 }
 0x4e0   :  { %2009 = vmatprep.subr.bf16.mxu1 %v2318_v0 }
 0x4e3   :  { %2010 = vmatpush3.bf16.msra.mxu1 %v2091_v32 }
 0x4e4   :  { %2011 = vmatprep.subr.bf16.mxu1 %v2318_v0 }
 0x4e7   :  { %2012 = vmatpush3.bf16.msra.mxu1 %v2092_v16 }
 0x4e8   :  { %2013 = vmatprep.subr.bf16.mxu1 %v2318_v0 }
 0x4eb   :  { %2014 = vmatpush3.bf16.msra.mxu1 %v2093_v27 }
 0x53a   :  { %v2043_v1 = vpop.permute.xlu0 %2042 }
 0x53b   :  { %v2045_v42 = vunpack.i.h.bf16 %v2043_v1  ;;  %v2044_v10 = vunpack.i.l.bf16 %v2043_v1 }
 0x53d   :  { %v1443_v18 = vsel %vm1441_vm14, %v1402_v12, %v2045_v42  ;;  %v1442_v24 = vsel %vm1441_vm14, %v1395_v15, %v2044_v10 }
 0x53e   :  { %v1830_v17 = vpack.c.bf16 %v1443_v18, %v1442_v24 }
 0x540   :  { %1996 = vmatmul.mubr.msk.bf16.vlgmr.msra.gmra.mxu0 %vm1829_vm0, %v1830_v17 }
 0x600   :  { %v1551_v13 = vpop.f32.mrf.mxu0 }
 0x601   :  { %v1552_v56 = vadd.f32 %v1820_v35, %v1551_v13 }
 0x602   :  { %v1997_v36 = vpop.f32.mrf.mxu0 }
 0x604   :  { %v1554_v37 = vpop.f32.mrf.mxu0 }
 0x605   :  { %v1555_v38 = vadd.f32 %v1820_v35, %v1554_v37 }
 0x606   :  { %v1998_v39 = vpop.f32.mrf.mxu0 }
 0x607   :  { %v1558_v40 = vadd.f32 %v1555_v38, %v1552_v56 }
 0x609   :  { %v1559_v5 = vrot.slane %v1558_v40, 4 }
 0x60b   :  { %v1560_v45 = vadd.f32 %v1559_v5, %v1558_v40  ;;  %v1843_v40 = vld [vmem:[#allocation14 + $0xc] ss:$0 sm:$0xff] }
 0x60d   :  { %v1561_v46 = vrot.slane %v1560_v45, 2 }
 0x60f   :  { %v1562_v6 = vadd.f32 %v1561_v46, %v1560_v45  ;;  %v1844_v46 = vld [vmem:[#allocation14 + $0xd] ss:$0 sm:$0xff] }
 0x611   :  { %v1563_v48 = vrot.slane %v1562_v6, 1 }
 0x613   :  { %v1564_v49 = vadd.f32 %v1563_v48, %v1562_v6 }
 0x615   :  { %v1565_v58 = vmul.f32 0.0625, %v1564_v49 }
 0x617   :  { %v1566_v22 = vsub.f32 %v1552_v56, %v1565_v58  ;;  %v1567_v31 = vsub.f32 %v1555_v38, %v1565_v58 }
 0x619   :  { %v1568_v44 = vmul.f32 %v1566_v22, %v1566_v22  ;;  %v1569_v0 = vmul.f32 %v1567_v31, %v1567_v31 }
 0x61b   :  { %v1570_v50 = vadd.f32 %v1569_v0, %v1568_v44 }
 0x61d   :  { %v1571_v19 = vrot.slane %v1570_v50, 4 }
 0x61f   :  { %v1572_v34 = vadd.f32 %v1571_v19, %v1570_v50 }
 0x621   :  { %v1573_v52 = vrot.slane %v1572_v34, 2 }
 0x623   :  { %v1574_v53 = vadd.f32 %v1573_v52, %v1572_v34 }
 0x625   :  { %v1575_v55 = vrot.slane %v1574_v53, 1 }
 0x627   :  { %v1576_v20 = vadd.f32 %v1575_v55, %v1574_v53 }
 0x629   :  { %v1577_v47 = vmul.f32 0.0625, %v1576_v20 }
 0x62b   :  { %v1578_v21 = vadd.f32 1e-05, %v1577_v47 }
 0x62d   :  { %2110 = vrsqrt.f32 %v1578_v21 }
 0x63a   :  { %v2111_v25 = vpop.eup %2110 }
 0x63b   :  { %v1580_v61 = vmul.f32 %v2111_v25, %v1566_v22  ;;  %v1581_v2 = vmul.f32 %v2111_v25, %v1567_v31 }
 0x63d   :  { %v1587_v26 = vmul.f32 %v1832_v59, %v1580_v61  ;;  %v1588_v23 = vmul.f32 %v1832_v59, %v1581_v2 }
 0x63f   :  { %v1594_v60 = vadd.f32 %v1833_v51, %v1587_v26  ;;  %v1595_v62 = vadd.f32 %v1833_v51, %v1588_v23 }
 0x641   :  { %vm1596_vm1 = vcmp.ge.f32.partialorder %v1594_v60, 0.0  ;;  %vm1597_vm2 = vcmp.ge.f32.partialorder %v1595_v62, 0.0  ;;  %v1598_v63 = vmul.f32 0.01, %v1594_v60  ;;  %v1599_v3 = vmul.f32 0.01, %v1595_v62 }
 0x643   :  { %v1600_v54 = vsel %vm1596_vm1, %v1594_v60, %v1598_v63  ;;  %v1601_v4 = vsel %vm1597_vm2, %v1595_v62, %v1599_v3 }
 0x644   :  { %v1618_v7 = vpack.c.bf16 %v1601_v4, %v1600_v54 }
 0x646   :  { %2016 = vmatmul.mubr.bf16.vlgmr.msra.gmra.mxu1 %v1618_v7 }
 0x706   :  { %v1706_v8 = vpop.f32.mrf.mxu1 }
 0x707   :  { %v1707_v11 = vadd.f32 %v1834_v9, %v1706_v8 }
 0x708   :  { %v2017_v14 = vpop.f32.mrf.mxu1 }
 0x70a   :  { %v1709_v57 = vpop.f32.mrf.mxu1 }
 0x70b   :  { %v1710_v43 = vadd.f32 %v1834_v9, %v1709_v57 }
 0x70c   :  { %v2018_v12 = vpop.f32.mrf.mxu1 }
 0x70d   :  { %v1713_v15 = vadd.f32 %v1710_v43, %v1707_v11 }
 0x70f   :  { %v1714_v1 = vrot.slane %v1713_v15, 4 }
 0x711   :  { %v1715_v42 = vadd.f32 %v1714_v1, %v1713_v15 }
 0x713   :  { %v1716_v10 = vrot.slane %v1715_v42, 2 }
 0x715   :  { %v1717_v18 = vadd.f32 %v1716_v10, %v1715_v42 }
 0x717   :  { %v1718_v24 = vrot.slane %v1717_v18, 1 }
 0x719   :  { %v1719_v17 = vadd.f32 %v1718_v24, %v1717_v18 }
 0x71b   :  { %v1720_v33 = vmul.f32 0.0625, %v1719_v17 }
 0x71d   :  { %v1721_v41 = vsub.f32 %v1707_v11, %v1720_v33  ;;  %v1722_v28 = vsub.f32 %v1710_v43, %v1720_v33 }
 0x71f   :  { %v1723_v29 = vmul.f32 %v1721_v41, %v1721_v41  ;;  %v1724_v30 = vmul.f32 %v1722_v28, %v1722_v28 }
 0x721   :  { %v1725_v32 = vadd.f32 %v1724_v30, %v1723_v29 }
 0x723   :  { %v1726_v16 = vrot.slane %v1725_v32, 4 }
 0x725   :  { %v1727_v27 = vadd.f32 %v1726_v16, %v1725_v32 }
 0x727   :  { %v1728_v13 = vrot.slane %v1727_v27, 2 }
 0x729   :  { %v1729_v35 = vadd.f32 %v1728_v13, %v1727_v27 }
 0x72b   :  { %v1730_v36 = vrot.slane %v1729_v35, 1 }
 0x72d   :  { %v1731_v37 = vadd.f32 %v1730_v36, %v1729_v35 }
 0x72f   :  { %v1732_v56 = vmul.f32 0.0625, %v1731_v37 }
 0x731   :  { %v1733_v38 = vadd.f32 1e-05, %v1732_v56 }
 0x733   :  { %2112 = vrsqrt.f32 %v1733_v38 }
 0x740   :  { %v2113_v39 = vpop.eup %2112 }
 0x741   :  { %v1735_v5 = vmul.f32 %v2113_v39, %v1721_v41  ;;  %v1736_v45 = vmul.f32 %v2113_v39, %v1722_v28 }
 0x743   :  { %v1742_v6 = vmul.f32 %v1843_v40, %v1735_v5  ;;  %v1743_v48 = vmul.f32 %v1843_v40, %v1736_v45 }
 0x745   :  { %v1750_v49 = vadd.f32 %v1844_v46, %v1743_v48  ;;  %v1749_v58 = vadd.f32 %v1844_v46, %v1742_v6 }
 0x747   :  { %vm1751_vm3 = vcmp.ge.f32.partialorder %v1749_v58, 0.0  ;;  %vm1752_vm4 = vcmp.ge.f32.partialorder %v1750_v49, 0.0  ;;  %v1753_v22 = vmul.f32 0.01, %v1749_v58  ;;  %v1754_v31 = vmul.f32 0.01, %v1750_v49 }
 0x749   :  { %v1755_v44 = vsel %vm1751_vm3, %v1749_v58, %v1753_v22  ;;  %v1756_v0 = vsel %vm1752_vm4, %v1750_v49, %v1754_v31 }
 0x74a   :  { %1757 = vst [vmem:[#allocation16] sm:$0xff] %v1755_v44  ;;  %1758 = vst [vmem:[#allocation16 + $0x8] sm:$0xff] %v1756_v0 }
 0x74b   :  { %2285 = shalt.err (!%p2282_p2)
}
 0x74c   :  { %1770 = dma.vmem_to_hbm [thread:$0]  %s1765_s25, 256, %s2703_s8, [#allocation4], %s2312_s3, %s2312_s3, %s2313_s24  }
 0x74d   :  { %2304 = dma.done.wait [#allocation4], 256  }
 0x74e   :  { %2305 = vsyncadd [#allocation4], 4294967040 }
 0x74f   :  { %1774 = vsyncpa [#allocation3], 1 }
 0x750   :  { %1775 = vsyncpa [#allocation6], 1 }
 0x751   :  { %1776 = vsyncpa [#allocation9], 1 }
 0x752   :  { %1777 = vsyncpa [#allocation12], 1 }
 0x753   :  { %1778 = vsyncpa [#allocation15], 1 }
 0x754   :  { %1779 = vsyncpa [#allocation4], 1 }

</bundles_post_ra>
